<compile_context>
chip_gen: v6e
topology: v6e:2x2x1
jax: 0.10.0
libtpu: 0.0.40
codegen_flags: <defaults>
</compile_context>

<pallas_src>
import math

import jax
import jax.numpy as jnp
from jax.experimental import pallas as pl
from jax.experimental.pallas import tpu as pltpu


def _round_up(x, m):
    return ((x + m - 1) // m) * m


def _sublane_multiple(dtype):
    # Minimum second-to-last tile dim: 8 (f32), 16 (bf16), 32 (int8/fp8).
    return max(8, 32 // jnp.dtype(dtype).itemsize)


def _vmem_limit_bytes():
    # Generation-aware VMEM budget, leaving headroom for compiler-internal
    # scratch/semaphores: v7x (64 MiB physical) -> 48 MiB; v5e/v6e -> 100 MiB.
    try:
        cap = int(pltpu.get_tpu_info().vmem_capacity_bytes)
    except Exception:
        cap = 64 * 1024 * 1024  # conservative fallback (safe on every chip)
    return max(32 * 1024 * 1024, min(cap - 16 * 1024 * 1024, 100 * 1024 * 1024))


def _erf(x):
    # Abramowitz & Stegun 7.1.26 polynomial erf, max abs error ~1.5e-7; built
    # only from elementwise ops guaranteed to lower in Mosaic.
    # TODO(synk): swap for lax.erf once a native Mosaic erf lowering is guaranteed.
    p = 0.3275911
    a1, a2, a3, a4, a5 = (0.254829592, -0.284496736, 1.421413741,
                          -1.453152027, 1.061405429)
    sgn = jnp.where(x >= 0.0, 1.0, -1.0)
    ax = jnp.abs(x)
    t = 1.0 / (1.0 + p * ax)
    poly = ((((a5 * t + a4) * t + a3) * t + a2) * t + a1) * t
    return sgn * (1.0 - poly * jnp.exp(-ax * ax))


def _gelu_exact(x):
    # BERT's exact (erf-based) GELU: x * 0.5 * (1 + erf(x / sqrt(2)))
    return x * 0.5 * (1.0 + _erf(x * (1.0 / math.sqrt(2.0))))


def bert_lm_head_kernel(x_ref, w1_ref, b1_ref, g_ref, be_ref, wd_ref, bd_ref,
                        o_ref, t_ref):
    j = pl.program_id(1)

    # Transform stage: dense(H->H) + GELU + LayerNorm. Computed once per row
    # tile (j == 0), cached (in the compute dtype) in VMEM scratch t_ref and
    # reused for every vocab-column tile.
    @pl.when(j == 0)
    def _transform():
        h = jnp.dot(x_ref[...], w1_ref[...], preferred_element_type=jnp.float32)
        h = h + b1_ref[...].astype(jnp.float32)
        h = _gelu_exact(h)
        # LayerNorm (eps=1e-12), single-pass sums: var = E[h^2] - mean^2.
        inv_h = 1.0 / h.shape[-1]
        mean = jnp.sum(h, axis=-1, keepdims=True) * inv_h
        msq = jnp.sum(h * h, axis=-1, keepdims=True) * inv_h
        var = jnp.maximum(msq - mean * mean, 0.0)
        hn = (h - mean) * jax.lax.rsqrt(var + 1e-12)
        t = hn * g_ref[...].astype(jnp.float32) + be_ref[...].astype(jnp.float32)
        # Cast to the compute dtype so the decoder matmul LHS matches the
        # weight dtype (bf16 LHS -> bf16 MXU path on v6e/v7x).
        t_ref[...] = t.astype(t_ref.dtype)

    # Decoder stage: [tm, H] @ [H, tv] (f32 accumulation) + bias tile.
    logits = jnp.dot(t_ref[...], wd_ref[...], preferred_element_type=jnp.float32)
    o_ref[...] = (logits + bd_ref[...].astype(jnp.float32)).astype(o_ref.dtype)


def prepare_bert_lm_head_params(dense_weight, dense_bias, ln_gamma, ln_beta,
                                embedding_weight, decoder_bias, *,
                                tv=1024, compute_dtype=None):
    """One-time parameter prep (run at init time, NOT per forward call).

    dense_weight:     [H, H]  PyTorch nn.Linear layout (out, in) -> transposed.
    embedding_weight: [V, H]  tied embedding matrix -> transposed to [H, V] and
                              vocab padded up to a multiple of tile tv.
    compute_dtype:    optional dtype (e.g. jnp.bfloat16) for the two big
                      matmul weights; activations are cast to match per call.
    """
    V, H = embedding_weight.shape
    tv = min(tv, _round_up(V, 128))
    Vp = _round_up(V, tv)

    w1 = dense_weight.T
    wd = embedding_weight.T
    bd = decoder_bias.reshape(1, V)
    if Vp != V:
        wd = jnp.pad(wd, ((0, 0), (0, Vp - V)))
        bd = jnp.pad(bd, ((0, 0), (0, Vp - V)))
    if compute_dtype is not None:
        w1 = w1.astype(compute_dtype)
        wd = wd.astype(compute_dtype)

    return dict(w1=w1, b1=dense_bias.reshape(1, H), gamma=ln_gamma.reshape(1, H),
                beta=ln_beta.reshape(1, H), wd=wd, bd=bd,
                vocab_size=V, tv=tv)


def bert_lm_prediction_head(hidden_states, params, *, tm=512, out_dtype=None,
                            split_rows_for_megacore=True):
    """hidden_states: [B, S, H]; params from prepare_bert_lm_head_params.
    Returns logits [B, S, V] in out_dtype (default: hidden_states.dtype)."""
    B, S, H = hidden_states.shape
    w1, b1, gamma, beta = params["w1"], params["b1"], params["gamma"], params["beta"]
    wd, bd = params["wd"], params["bd"]
    V, tv = params["vocab_size"], params["tv"]
    Vp = wd.shape[1]

    compute_dtype = w1.dtype
    if out_dtype is None:
        out_dtype = hidden_states.dtype

    N = B * S
    sub = _sublane_multiple(compute_dtype)

    # Clamp the row tile to the (sublane-rounded) problem size.
    tm = min(tm, _round_up(N, sub))
    # v7x has 2 TensorCores and only the row axis is "parallel": if the whole
    # batch fits one row tile, split it so both cores get work (trades one
    # extra W_dec streaming pass, which is cheap at small N).
    if split_rows_for_megacore and N > sub and tm >= _round_up(N, sub):
        tm = _round_up((N + 1) // 2, sub)
    Np = _round_up(N, tm)

    x = hidden_states.reshape(N, H).astype(compute_dtype)
    if Np != N:
        x = jnp.pad(x, ((0, Np - N), (0, 0)))

    grid = (Np // tm, Vp // tv)

    itemsize = jnp.dtype(compute_dtype).itemsize
    out_itemsize = jnp.dtype(out_dtype).itemsize
    cost = pl.CostEstimate(
        flops=2 * Np * H * H + 2 * Np * H * Vp,
        transcendentals=Np * H,  # one exp per GELU element
        bytes_accessed=int(
            Np * H * itemsize                                    # x
            + H * H * itemsize + 3 * H * 4                       # w1 + b1/gamma/beta
            + grid[0] * (H * Vp * itemsize + Vp * bd.dtype.itemsize)  # streamed W_dec/bias
            + Np * Vp * out_itemsize                             # logits
        ),
    )

    def _run(single_buffer_constants):
        # Grid-invariant operands never get re-DMA'd; single-buffer them to
        # reclaim VMEM (funds the bigger tm/tv tiles, matters most on v7x).
        const_mode = ({"pipeline_mode": pl.Buffered(1)}
                      if single_buffer_constants else {})
        in_specs = [
            pl.BlockSpec((tm, H), lambda i, j: (i, 0)),                   # x row tile
            pl.BlockSpec((H, H), lambda i, j: (0, 0), **const_mode),      # transform weight
            pl.BlockSpec((1, H), lambda i, j: (0, 0), **const_mode),      # transform bias
            pl.BlockSpec((1, H), lambda i, j: (0, 0), **const_mode),      # LN gamma
            pl.BlockSpec((1, H), lambda i, j: (0, 0), **const_mode),      # LN beta
            pl.BlockSpec((H, tv), lambda i, j: (0, j)),                   # decoder wt tile
            pl.BlockSpec((1, tv), lambda i, j: (0, j)),                   # decoder bias tile
        ]
        out = pl.pallas_call(
            bert_lm_head_kernel,
            out_shape=jax.ShapeDtypeStruct((Np, Vp), out_dtype),
            grid_spec=pltpu.PrefetchScalarGridSpec(
                num_scalar_prefetch=0,
                grid=grid,
                in_specs=in_specs,
                out_specs=pl.BlockSpec((tm, tv), lambda i, j: (i, j)),
                scratch_shapes=[pltpu.VMEM((tm, H), compute_dtype)],  # cached transform
            ),
            compiler_params=pltpu.CompilerParams(
                dimension_semantics=("parallel", "arbitrary"),
                vmem_limit_bytes=_vmem_limit_bytes(),
            ),
            cost_estimate=cost,
        )(x, w1, b1, gamma, beta, wd, bd)
        return jax.block_until_ready(out)

    try:
        out = _run(True)
    except Exception:
        # Single-buffering constants is purely a VMEM-headroom optimization;
        # fall back to default double buffering if the pipeline mode rejects.
        out = _run(False)

    return out[:N, :V].reshape(B, S, V)


def reference(hidden_states, dense_weight, dense_bias, gamma, beta,
              embedding_weight, decoder_bias):
    hp = jax.lax.Precision.HIGHEST
    h = jnp.einsum("bsh,kh->bsk", hidden_states, dense_weight, precision=hp) + dense_bias
    h = h * 0.5 * (1.0 + jax.scipy.special.erf(h / math.sqrt(2.0)))
    mean = jnp.mean(h, axis=-1, keepdims=True)
    var = jnp.mean((h - mean) ** 2, axis=-1, keepdims=True)
    h = gamma * (h - mean) / jnp.sqrt(var + 1e-12) + beta
    return jnp.einsum("bsh,vh->bsv", h, embedding_weight, precision=hp) + decoder_bias


if __name__ == "__main__":
    # Small BERT-like config with lane-dense dims: hidden=128, vocab=2048.
    B, S, H, V = 2, 8, 128, 2048
    key = jax.random.PRNGKey(0)
    k1, k2, k3, k4, k5, k6, k7 = jax.random.split(key, 7)

    hidden_states = jax.random.normal(k1, (B, S, H), dtype=jnp.float32)

    # transform.dense: nn.Linear(H, H) weight in PyTorch [out, in] layout.
    dense_weight = jax.random.normal(k2, (H, H), dtype=jnp.float32) * 0.02
    dense_bias = jax.random.normal(k3, (H,), dtype=jnp.float32) * 0.02
    gamma = 1.0 + 0.1 * jax.random.normal(k4, (H,), dtype=jnp.float32)
    beta = 0.1 * jax.random.normal(k5, (H,), dtype=jnp.float32)

    # decoder: tied embedding matrix [V, H]; decoder(h) = h @ E.T + bias.
    embedding = jax.random.normal(k6, (V, H), dtype=jnp.float32) * 0.02
    decoder_bias = 0.01 * jax.random.normal(k7, (V,), dtype=jnp.float32)

    ref = reference(hidden_states, dense_weight, dense_bias, gamma, beta,
                    embedding, decoder_bias)

    # f32 path (tight tolerance against the HIGHEST-precision reference).
    params_f32 = prepare_bert_lm_head_params(dense_weight, dense_bias, gamma, beta,
                                             embedding, decoder_bias, tv=1024)
    out = bert_lm_prediction_head(hidden_states, params_f32)
    jax.block_until_ready(out)
    assert out.shape == (B, S, V)
    err_f32 = float(jnp.max(jnp.abs(out - ref)))
    assert jnp.allclose(out, ref, atol=2e-3, rtol=2e-3), err_f32

    # bf16 compute path (bf16 weights/activations, f32 accumulation + LN).
    params_bf16 = prepare_bert_lm_head_params(dense_weight, dense_bias, gamma, beta,
                                              embedding, decoder_bias, tv=1024,
                                              compute_dtype=jnp.bfloat16)
    out_bf16 = bert_lm_prediction_head(hidden_states, params_bf16,
                                       out_dtype=jnp.bfloat16)
    jax.block_until_ready(out_bf16)
    assert out_bf16.shape == (B, S, V)
    err_bf16 = float(jnp.max(jnp.abs(out_bf16.astype(jnp.float32) - ref)))
    assert jnp.allclose(out_bf16.astype(jnp.float32), ref, atol=0.05), err_bf16

    print("KERNEL_OK")
</pallas_src>

<mosaic_0001>
module attributes {stable_mosaic.version = 11 : i64} {
  func.func @bert_lm_head_kernel(%arg0: i32, %arg1: i32, %arg2: memref<8x128xf32, #tpu.memory_space<vmem>>, %arg3: memref<128x128xf32, #tpu.memory_space<vmem>>, %arg4: memref<1x128xf32, #tpu.memory_space<vmem>>, %arg5: memref<1x128xf32, #tpu.memory_space<vmem>>, %arg6: memref<1x128xf32, #tpu.memory_space<vmem>>, %arg7: memref<128x1024xf32, #tpu.memory_space<vmem>>, %arg8: memref<1x1024xf32, #tpu.memory_space<vmem>>, %arg9: memref<8x1024xf32, #tpu.memory_space<vmem>>, %arg10: memref<8x128xf32, #tpu.memory_space<vmem>>) attributes {dimension_semantics = [#tpu.dimension_semantics<parallel>, #tpu.dimension_semantics<arbitrary>], iteration_bounds = array<i64: 2, 2>, scalar_prefetch = 0 : i64, scratch_operands = 1 : i64, tpu.core_type = #tpu.core_type<tc>, window_params = [{transform_indices = @transform_0, window_bounds = array<i64: 8, 128>}, {pipeline_mode = #tpu.pipeline_mode<synchronous>, transform_indices = @transform_1, window_bounds = array<i64: 128, 128>}, {pipeline_mode = #tpu.pipeline_mode<synchronous>, transform_indices = @transform_2, window_bounds = array<i64: 1, 128>}, {pipeline_mode = #tpu.pipeline_mode<synchronous>, transform_indices = @transform_3, window_bounds = array<i64: 1, 128>}, {pipeline_mode = #tpu.pipeline_mode<synchronous>, transform_indices = @transform_4, window_bounds = array<i64: 1, 128>}, {transform_indices = @transform_5, window_bounds = array<i64: 128, 1024>}, {transform_indices = @transform_6, window_bounds = array<i64: 1, 1024>}, {transform_indices = @transform_7, window_bounds = array<i64: 8, 1024>}]} {
    %c0_i32 = arith.constant 0 : i32
    %0 = arith.cmpi eq, %arg1, %c0_i32 : i32
    %1 = arith.extui %0 : i1 to i32
    %c0_i32_0 = arith.constant 0 : i32
    %2 = arith.cmpi ne, %1, %c0_i32_0 : i32
    scf.if %2 {
      %c0_8 = arith.constant 0 : index
      %c0_9 = arith.constant 0 : index
      %10 = vector.load %arg2[%c0_8, %c0_9] : memref<8x128xf32, #tpu.memory_space<vmem>>, vector<8x128xf32>
      %c0_10 = arith.constant 0 : index
      %c0_11 = arith.constant 0 : index
      %11 = vector.load %arg3[%c0_10, %c0_11] : memref<128x128xf32, #tpu.memory_space<vmem>>, vector<128x128xf32>
      %cst_12 = arith.constant dense<0.000000e+00> : vector<8x128xf32>
      %12 = tpu.matmul %10, %11, %cst_12 {dimension_numbers = #tpu.dot_dimension_numbers<[1], [0], [0], [1], [0, 0, 1, 1], [], []>} : vector<8x128xf32>, vector<128x128xf32>, vector<8x128xf32> -> vector<8x128xf32>
      %c0_13 = arith.constant 0 : index
      %c0_14 = arith.constant 0 : index
      %13 = vector.load %arg4[%c0_13, %c0_14] : memref<1x128xf32, #tpu.memory_space<vmem>>, vector<1x128xf32>
      %14 = vector.broadcast %13 : vector<1x128xf32> to vector<8x128xf32>
      %15 = arith.addf %12, %14 : vector<8x128xf32>
      %cst_15 = arith.constant 5.000000e-01 : f32
      %16 = vector.broadcast %cst_15 : f32 to vector<8x128xf32>
      %17 = arith.mulf %15, %16 : vector<8x128xf32>
      %cst_16 = arith.constant 0.707106769 : f32
      %18 = vector.broadcast %cst_16 : f32 to vector<8x128xf32>
      %19 = arith.mulf %15, %18 : vector<8x128xf32>
      %cst_17 = arith.constant 0.000000e+00 : f32
      %20 = vector.broadcast %cst_17 : f32 to vector<8x128xf32>
      %21 = arith.cmpf oge, %19, %20 : vector<8x128xf32>
      %cst_18 = arith.constant 1.000000e+00 : f32
      %cst_19 = arith.constant -1.000000e+00 : f32
      %22 = vector.broadcast %cst_18 : f32 to vector<8x128xf32>
      %23 = vector.broadcast %cst_19 : f32 to vector<8x128xf32>
      %24 = arith.select %21, %22, %23 : vector<8x128xi1>, vector<8x128xf32>
      %25 = math.absf %19 : vector<8x128xf32>
      %cst_20 = arith.constant 0.327591091 : f32
      %26 = vector.broadcast %cst_20 : f32 to vector<8x128xf32>
      %27 = arith.mulf %26, %25 : vector<8x128xf32>
      %cst_21 = arith.constant 1.000000e+00 : f32
      %28 = vector.broadcast %cst_21 : f32 to vector<8x128xf32>
      %29 = arith.addf %28, %27 : vector<8x128xf32>
      %cst_22 = arith.constant 1.000000e+00 : f32
      %30 = vector.broadcast %cst_22 : f32 to vector<8x128xf32>
      %31 = arith.divf %30, %29 : vector<8x128xf32>
      %cst_23 = arith.constant 1.06140542 : f32
      %32 = vector.broadcast %cst_23 : f32 to vector<8x128xf32>
      %33 = arith.mulf %32, %31 : vector<8x128xf32>
      %cst_24 = arith.constant -1.45315206 : f32
      %34 = vector.broadcast %cst_24 : f32 to vector<8x128xf32>
      %35 = arith.addf %33, %34 : vector<8x128xf32>
      %36 = arith.mulf %35, %31 : vector<8x128xf32>
      %cst_25 = arith.constant 1.42141378 : f32
      %37 = vector.broadcast %cst_25 : f32 to vector<8x128xf32>
      %38 = arith.addf %36, %37 : vector<8x128xf32>
      %39 = arith.mulf %38, %31 : vector<8x128xf32>
      %cst_26 = arith.constant -0.284496725 : f32
      %40 = vector.broadcast %cst_26 : f32 to vector<8x128xf32>
      %41 = arith.addf %39, %40 : vector<8x128xf32>
      %42 = arith.mulf %41, %31 : vector<8x128xf32>
      %cst_27 = arith.constant 0.254829586 : f32
      %43 = vector.broadcast %cst_27 : f32 to vector<8x128xf32>
      %44 = arith.addf %42, %43 : vector<8x128xf32>
      %45 = arith.mulf %44, %31 : vector<8x128xf32>
      %cst_28 = arith.constant 0.000000e+00 : f32
      %46 = vector.broadcast %cst_28 : f32 to vector<8x128xf32>
      %47 = arith.subf %46, %25 : vector<8x128xf32>
      %48 = arith.mulf %47, %25 : vector<8x128xf32>
      %49 = math.exp %48 : vector<8x128xf32>
      %50 = arith.mulf %45, %49 : vector<8x128xf32>
      %cst_29 = arith.constant 1.000000e+00 : f32
      %51 = vector.broadcast %cst_29 : f32 to vector<8x128xf32>
      %52 = arith.subf %51, %50 : vector<8x128xf32>
      %53 = arith.mulf %24, %52 : vector<8x128xf32>
      %cst_30 = arith.constant 1.000000e+00 : f32
      %54 = vector.broadcast %cst_30 : f32 to vector<8x128xf32>
      %55 = arith.addf %54, %53 : vector<8x128xf32>
      %56 = arith.mulf %17, %55 : vector<8x128xf32>
      %cst_31 = arith.constant dense<0.000000e+00> : vector<8xf32>
      %57 = vector.multi_reduction <add>, %56, %cst_31 [1] : vector<8x128xf32> to vector<8xf32>
      %58 = vector.shape_cast %57 : vector<8xf32> to vector<8x1xf32>
      %cst_32 = arith.constant 7.812500e-03 : f32
      %59 = vector.broadcast %cst_32 : f32 to vector<8x1xf32>
      %60 = arith.mulf %58, %59 : vector<8x1xf32>
      %61 = arith.mulf %56, %56 : vector<8x128xf32>
      %cst_33 = arith.constant dense<0.000000e+00> : vector<8xf32>
      %62 = vector.multi_reduction <add>, %61, %cst_33 [1] : vector<8x128xf32> to vector<8xf32>
      %63 = vector.shape_cast %62 : vector<8xf32> to vector<8x1xf32>
      %cst_34 = arith.constant 7.812500e-03 : f32
      %64 = vector.broadcast %cst_34 : f32 to vector<8x1xf32>
      %65 = arith.mulf %63, %64 : vector<8x1xf32>
      %66 = arith.mulf %60, %60 : vector<8x1xf32>
      %67 = arith.subf %65, %66 : vector<8x1xf32>
      %cst_35 = arith.constant 0.000000e+00 : f32
      %68 = vector.broadcast %cst_35 : f32 to vector<8x1xf32>
      %69 = arith.maximumf %67, %68 : vector<8x1xf32>
      %70 = vector.broadcast %60 : vector<8x1xf32> to vector<8x128xf32>
      %71 = arith.subf %56, %70 : vector<8x128xf32>
      %cst_36 = arith.constant 9.99999996E-13 : f32
      %72 = vector.broadcast %cst_36 : f32 to vector<8x1xf32>
      %73 = arith.addf %69, %72 : vector<8x1xf32>
      %74 = math.rsqrt %73 : vector<8x1xf32>
      %75 = vector.broadcast %74 : vector<8x1xf32> to vector<8x128xf32>
      %76 = arith.mulf %71, %75 : vector<8x128xf32>
      %c0_37 = arith.constant 0 : index
      %c0_38 = arith.constant 0 : index
      %77 = vector.load %arg5[%c0_37, %c0_38] : memref<1x128xf32, #tpu.memory_space<vmem>>, vector<1x128xf32>
      %78 = vector.broadcast %77 : vector<1x128xf32> to vector<8x128xf32>
      %79 = arith.mulf %76, %78 : vector<8x128xf32>
      %c0_39 = arith.constant 0 : index
      %c0_40 = arith.constant 0 : index
      %80 = vector.load %arg6[%c0_39, %c0_40] : memref<1x128xf32, #tpu.memory_space<vmem>>, vector<1x128xf32>
      %81 = vector.broadcast %80 : vector<1x128xf32> to vector<8x128xf32>
      %82 = arith.addf %79, %81 : vector<8x128xf32>
      %c0_41 = arith.constant 0 : index
      %c0_42 = arith.constant 0 : index
      %83 = vector.load %arg10[%c0_41, %c0_42] : memref<8x128xf32, #tpu.memory_space<vmem>>, vector<8x128xf32>
      tpu.vector_store %arg10[%c0_41, %c0_42], %82 {strides = array<i32>} : memref<8x128xf32, #tpu.memory_space<vmem>>, vector<8x128xf32>,
    } else {
    }
    %c0 = arith.constant 0 : index
    %c0_1 = arith.constant 0 : index
    %3 = vector.load %arg10[%c0, %c0_1] : memref<8x128xf32, #tpu.memory_space<vmem>>, vector<8x128xf32>
    %c0_2 = arith.constant 0 : index
    %c0_3 = arith.constant 0 : index
    %4 = vector.load %arg7[%c0_2, %c0_3] : memref<128x1024xf32, #tpu.memory_space<vmem>>, vector<128x1024xf32>
    %cst = arith.constant dense<0.000000e+00> : vector<8x1024xf32>
    %5 = tpu.matmul %3, %4, %cst {dimension_numbers = #tpu.dot_dimension_numbers<[1], [0], [0], [1], [0, 0, 1, 1], [], []>} : vector<8x128xf32>, vector<128x1024xf32>, vector<8x1024xf32> -> vector<8x1024xf32>
    %c0_4 = arith.constant 0 : index
    %c0_5 = arith.constant 0 : index
    %6 = vector.load %arg8[%c0_4, %c0_5] : memref<1x1024xf32, #tpu.memory_space<vmem>>, vector<1x1024xf32>
    %7 = vector.broadcast %6 : vector<1x1024xf32> to vector<8x1024xf32>
    %8 = arith.addf %5, %7 : vector<8x1024xf32>
    %c0_6 = arith.constant 0 : index
    %c0_7 = arith.constant 0 : index
    %9 = vector.load %arg9[%c0_6, %c0_7] : memref<8x1024xf32, #tpu.memory_space<vmem>>, vector<8x1024xf32>
    tpu.vector_store %arg9[%c0_6, %c0_7], %8 {strides = array<i32>} : memref<8x1024xf32, #tpu.memory_space<vmem>>, vector<8x1024xf32>,
    return
  }
  func.func @transform_0(%arg0: i32, %arg1: i32) -> (i32, i32) {
    %c0_i32 = arith.constant 0 : i32
    %c0_i32_0 = arith.constant 0 : i32
    return %arg0, %c0_i32 : i32, i32
  }
  func.func @transform_1(%arg0: i32, %arg1: i32) -> (i32, i32) {
    %c0_i32 = arith.constant 0 : i32
    %c0_i32_0 = arith.constant 0 : i32
    %c0_i32_1 = arith.constant 0 : i32
    return %c0_i32, %c0_i32_0 : i32, i32
  }
  func.func @transform_2(%arg0: i32, %arg1: i32) -> (i32, i32) {
    %c0_i32 = arith.constant 0 : i32
    %c0_i32_0 = arith.constant 0 : i32
    %c0_i32_1 = arith.constant 0 : i32
    return %c0_i32, %c0_i32_0 : i32, i32
  }
  func.func @transform_3(%arg0: i32, %arg1: i32) -> (i32, i32) {
    %c0_i32 = arith.constant 0 : i32
    %c0_i32_0 = arith.constant 0 : i32
    %c0_i32_1 = arith.constant 0 : i32
    return %c0_i32, %c0_i32_0 : i32, i32
  }
  func.func @transform_4(%arg0: i32, %arg1: i32) -> (i32, i32) {
    %c0_i32 = arith.constant 0 : i32
    %c0_i32_0 = arith.constant 0 : i32
    %c0_i32_1 = arith.constant 0 : i32
    return %c0_i32, %c0_i32_0 : i32, i32
  }
  func.func @transform_5(%arg0: i32, %arg1: i32) -> (i32, i32) {
    %c0_i32 = arith.constant 0 : i32
    %c0_i32_0 = arith.constant 0 : i32
    return %c0_i32, %arg1 : i32, i32
  }
  func.func @transform_6(%arg0: i32, %arg1: i32) -> (i32, i32) {
    %c0_i32 = arith.constant 0 : i32
    %c0_i32_0 = arith.constant 0 : i32
    return %c0_i32, %arg1 : i32, i32
  }
  func.func @transform_7(%arg0: i32, %arg1: i32) -> (i32, i32) {
    %c0_i32 = arith.constant 0 : i32
    return %arg0, %arg1 : i32, i32
  }
}

module attributes {stable_mosaic.version = 11 : i64} {
  func.func @bert_lm_head_kernel(%arg0: i32, %arg1: i32, %arg2: memref<8x128xf32, #tpu.memory_space<vmem>>, %arg3: memref<128x128xf32, #tpu.memory_space<vmem>>, %arg4: memref<1x128xf32, #tpu.memory_space<vmem>>, %arg5: memref<1x128xf32, #tpu.memory_space<vmem>>, %arg6: memref<1x128xf32, #tpu.memory_space<vmem>>, %arg7: memref<128x1024xf32, #tpu.memory_space<vmem>>, %arg8: memref<1x1024xf32, #tpu.memory_space<vmem>>, %arg9: memref<8x1024xf32, #tpu.memory_space<vmem>>, %arg10: memref<8x128xf32, #tpu.memory_space<vmem>>) attributes {dimension_semantics = [#tpu.dimension_semantics<parallel>, #tpu.dimension_semantics<arbitrary>], iteration_bounds = array<i64: 2, 2>, scalar_prefetch = 0 : i64, scratch_operands = 1 : i64, tpu.core_type = #tpu.core_type<tc>, window_params = [{transform_indices = @transform_0, window_bounds = array<i64: 8, 128>}, {pipeline_mode = #tpu.pipeline_mode<synchronous>, transform_indices = @transform_1, window_bounds = array<i64: 128, 128>}, {pipeline_mode = #tpu.pipeline_mode<synchronous>, transform_indices = @transform_2, window_bounds = array<i64: 1, 128>}, {pipeline_mode = #tpu.pipeline_mode<synchronous>, transform_indices = @transform_3, window_bounds = array<i64: 1, 128>}, {pipeline_mode = #tpu.pipeline_mode<synchronous>, transform_indices = @transform_4, window_bounds = array<i64: 1, 128>}, {transform_indices = @transform_5, window_bounds = array<i64: 128, 1024>}, {transform_indices = @transform_6, window_bounds = array<i64: 1, 1024>}, {transform_indices = @transform_7, window_bounds = array<i64: 8, 1024>}]} {
    %c0_i32 = arith.constant 0 : i32
    %0 = arith.cmpi eq, %arg1, %c0_i32 : i32
    %1 = arith.extui %0 : i1 to i32
    %c0_i32_0 = arith.constant 0 : i32
    %2 = arith.cmpi ne, %1, %c0_i32_0 : i32
    scf.if %2 {
      %c0_8 = arith.constant 0 : index
      %c0_9 = arith.constant 0 : index
      %10 = vector.load %arg2[%c0_8, %c0_9] : memref<8x128xf32, #tpu.memory_space<vmem>>, vector<8x128xf32>
      %c0_10 = arith.constant 0 : index
      %c0_11 = arith.constant 0 : index
      %11 = vector.load %arg3[%c0_10, %c0_11] : memref<128x128xf32, #tpu.memory_space<vmem>>, vector<128x128xf32>
      %cst_12 = arith.constant dense<0.000000e+00> : vector<8x128xf32>
      %12 = tpu.matmul %10, %11, %cst_12 {dimension_numbers = #tpu.dot_dimension_numbers<[1], [0], [0], [1], [0, 0, 1, 1], [], []>} : vector<8x128xf32>, vector<128x128xf32>, vector<8x128xf32> -> vector<8x128xf32>
      %c0_13 = arith.constant 0 : index
      %c0_14 = arith.constant 0 : index
      %13 = vector.load %arg4[%c0_13, %c0_14] : memref<1x128xf32, #tpu.memory_space<vmem>>, vector<1x128xf32>
      %14 = vector.broadcast %13 : vector<1x128xf32> to vector<8x128xf32>
      %15 = arith.addf %12, %14 : vector<8x128xf32>
      %cst_15 = arith.constant 5.000000e-01 : f32
      %16 = vector.broadcast %cst_15 : f32 to vector<8x128xf32>
      %17 = arith.mulf %15, %16 : vector<8x128xf32>
      %cst_16 = arith.constant 0.707106769 : f32
      %18 = vector.broadcast %cst_16 : f32 to vector<8x128xf32>
      %19 = arith.mulf %15, %18 : vector<8x128xf32>
      %cst_17 = arith.constant 0.000000e+00 : f32
      %20 = vector.broadcast %cst_17 : f32 to vector<8x128xf32>
      %21 = arith.cmpf oge, %19, %20 : vector<8x128xf32>
      %cst_18 = arith.constant 1.000000e+00 : f32
      %cst_19 = arith.constant -1.000000e+00 : f32
      %22 = vector.broadcast %cst_18 : f32 to vector<8x128xf32>
      %23 = vector.broadcast %cst_19 : f32 to vector<8x128xf32>
      %24 = arith.select %21, %22, %23 : vector<8x128xi1>, vector<8x128xf32>
      %25 = math.absf %19 : vector<8x128xf32>
      %cst_20 = arith.constant 0.327591091 : f32
      %26 = vector.broadcast %cst_20 : f32 to vector<8x128xf32>
      %27 = arith.mulf %26, %25 : vector<8x128xf32>
      %cst_21 = arith.constant 1.000000e+00 : f32
      %28 = vector.broadcast %cst_21 : f32 to vector<8x128xf32>
      %29 = arith.addf %28, %27 : vector<8x128xf32>
      %cst_22 = arith.constant 1.000000e+00 : f32
      %30 = vector.broadcast %cst_22 : f32 to vector<8x128xf32>
      %31 = arith.divf %30, %29 : vector<8x128xf32>
      %cst_23 = arith.constant 1.06140542 : f32
      %32 = vector.broadcast %cst_23 : f32 to vector<8x128xf32>
      %33 = arith.mulf %32, %31 : vector<8x128xf32>
      %cst_24 = arith.constant -1.45315206 : f32
      %34 = vector.broadcast %cst_24 : f32 to vector<8x128xf32>
      %35 = arith.addf %33, %34 : vector<8x128xf32>
      %36 = arith.mulf %35, %31 : vector<8x128xf32>
      %cst_25 = arith.constant 1.42141378 : f32
      %37 = vector.broadcast %cst_25 : f32 to vector<8x128xf32>
      %38 = arith.addf %36, %37 : vector<8x128xf32>
      %39 = arith.mulf %38, %31 : vector<8x128xf32>
      %cst_26 = arith.constant -0.284496725 : f32
      %40 = vector.broadcast %cst_26 : f32 to vector<8x128xf32>
      %41 = arith.addf %39, %40 : vector<8x128xf32>
      %42 = arith.mulf %41, %31 : vector<8x128xf32>
      %cst_27 = arith.constant 0.254829586 : f32
      %43 = vector.broadcast %cst_27 : f32 to vector<8x128xf32>
      %44 = arith.addf %42, %43 : vector<8x128xf32>
      %45 = arith.mulf %44, %31 : vector<8x128xf32>
      %cst_28 = arith.constant 0.000000e+00 : f32
      %46 = vector.broadcast %cst_28 : f32 to vector<8x128xf32>
      %47 = arith.subf %46, %25 : vector<8x128xf32>
      %48 = arith.mulf %47, %25 : vector<8x128xf32>
      %49 = math.exp %48 : vector<8x128xf32>
      %50 = arith.mulf %45, %49 : vector<8x128xf32>
      %cst_29 = arith.constant 1.000000e+00 : f32
      %51 = vector.broadcast %cst_29 : f32 to vector<8x128xf32>
      %52 = arith.subf %51, %50 : vector<8x128xf32>
      %53 = arith.mulf %24, %52 : vector<8x128xf32>
      %cst_30 = arith.constant 1.000000e+00 : f32
      %54 = vector.broadcast %cst_30 : f32 to vector<8x128xf32>
      %55 = arith.addf %54, %53 : vector<8x128xf32>
      %56 = arith.mulf %17, %55 : vector<8x128xf32>
      %cst_31 = arith.constant dense<0.000000e+00> : vector<8xf32>
      %57 = vector.multi_reduction <add>, %56, %cst_31 [1] : vector<8x128xf32> to vector<8xf32>
      %58 = vector.shape_cast %57 : vector<8xf32> to vector<8x1xf32>
      %cst_32 = arith.constant 7.812500e-03 : f32
      %59 = vector.broadcast %cst_32 : f32 to vector<8x1xf32>
      %60 = arith.mulf %58, %59 : vector<8x1xf32>
      %61 = arith.mulf %56, %56 : vector<8x128xf32>
      %cst_33 = arith.constant dense<0.000000e+00> : vector<8xf32>
      %62 = vector.multi_reduction <add>, %61, %cst_33 [1] : vector<8x128xf32> to vector<8xf32>
      %63 = vector.shape_cast %62 : vector<8xf32> to vector<8x1xf32>
      %cst_34 = arith.constant 7.812500e-03 : f32
      %64 = vector.broadcast %cst_34 : f32 to vector<8x1xf32>
      %65 = arith.mulf %63, %64 : vector<8x1xf32>
      %66 = arith.mulf %60, %60 : vector<8x1xf32>
      %67 = arith.subf %65, %66 : vector<8x1xf32>
      %cst_35 = arith.constant 0.000000e+00 : f32
      %68 = vector.broadcast %cst_35 : f32 to vector<8x1xf32>
      %69 = arith.maximumf %67, %68 : vector<8x1xf32>
      %70 = vector.broadcast %60 : vector<8x1xf32> to vector<8x128xf32>
      %71 = arith.subf %56, %70 : vector<8x128xf32>
      %cst_36 = arith.constant 9.99999996E-13 : f32
      %72 = vector.broadcast %cst_36 : f32 to vector<8x1xf32>
      %73 = arith.addf %69, %72 : vector<8x1xf32>
      %74 = math.rsqrt %73 : vector<8x1xf32>
      %75 = vector.broadcast %74 : vector<8x1xf32> to vector<8x128xf32>
      %76 = arith.mulf %71, %75 : vector<8x128xf32>
      %c0_37 = arith.constant 0 : index
      %c0_38 = arith.constant 0 : index
      %77 = vector.load %arg5[%c0_37, %c0_38] : memref<1x128xf32, #tpu.memory_space<vmem>>, vector<1x128xf32>
      %78 = vector.broadcast %77 : vector<1x128xf32> to vector<8x128xf32>
      %79 = arith.mulf %76, %78 : vector<8x128xf32>
      %c0_39 = arith.constant 0 : index
      %c0_40 = arith.constant 0 : index
      %80 = vector.load %arg6[%c0_39, %c0_40] : memref<1x128xf32, #tpu.memory_space<vmem>>, vector<1x128xf32>
      %81 = vector.broadcast %80 : vector<1x128xf32> to vector<8x128xf32>
      %82 = arith.addf %79, %81 : vector<8x128xf32>
      %c0_41 = arith.constant 0 : index
      %c0_42 = arith.constant 0 : index
      %83 = vector.load %arg10[%c0_41, %c0_42] : memref<8x128xf32, #tpu.memory_space<vmem>>, vector<8x128xf32>
      tpu.vector_store %arg10[%c0_41, %c0_42], %82 {strides = array<i32>} : memref<8x128xf32, #tpu.memory_space<vmem>>, vector<8x128xf32>,
    } else {
    }
    %c0 = arith.constant 0 : index
    %c0_1 = arith.constant 0 : index
    %3 = vector.load %arg10[%c0, %c0_1] : memref<8x128xf32, #tpu.memory_space<vmem>>, vector<8x128xf32>
    %c0_2 = arith.constant 0 : index
    %c0_3 = arith.constant 0 : index
    %4 = vector.load %arg7[%c0_2, %c0_3] : memref<128x1024xf32, #tpu.memory_space<vmem>>, vector<128x1024xf32>
    %cst = arith.constant dense<0.000000e+00> : vector<8x1024xf32>
    %5 = tpu.matmul %3, %4, %cst {dimension_numbers = #tpu.dot_dimension_numbers<[1], [0], [0], [1], [0, 0, 1, 1], [], []>} : vector<8x128xf32>, vector<128x1024xf32>, vector<8x1024xf32> -> vector<8x1024xf32>
    %c0_4 = arith.constant 0 : index
    %c0_5 = arith.constant 0 : index
    %6 = vector.load %arg8[%c0_4, %c0_5] : memref<1x1024xf32, #tpu.memory_space<vmem>>, vector<1x1024xf32>
    %7 = vector.broadcast %6 : vector<1x1024xf32> to vector<8x1024xf32>
    %8 = arith.addf %5, %7 : vector<8x1024xf32>
    %c0_6 = arith.constant 0 : index
    %c0_7 = arith.constant 0 : index
    %9 = vector.load %arg9[%c0_6, %c0_7] : memref<8x1024xf32, #tpu.memory_space<vmem>>, vector<8x1024xf32>
    tpu.vector_store %arg9[%c0_6, %c0_7], %8 {strides = array<i32>} : memref<8x1024xf32, #tpu.memory_space<vmem>>, vector<8x1024xf32>,
    return
  }
  func.func @transform_0(%arg0: i32, %arg1: i32) -> (i32, i32) {
    %c0_i32 = arith.constant 0 : i32
    %c0_i32_0 = arith.constant 0 : i32
    return %arg0, %c0_i32 : i32, i32
  }
  func.func @transform_1(%arg0: i32, %arg1: i32) -> (i32, i32) {
    %c0_i32 = arith.constant 0 : i32
    %c0_i32_0 = arith.constant 0 : i32
    %c0_i32_1 = arith.constant 0 : i32
    return %c0_i32, %c0_i32_0 : i32, i32
  }
  func.func @transform_2(%arg0: i32, %arg1: i32) -> (i32, i32) {
    %c0_i32 = arith.constant 0 : i32
    %c0_i32_0 = arith.constant 0 : i32
    %c0_i32_1 = arith.constant 0 : i32
    return %c0_i32, %c0_i32_0 : i32, i32
  }
  func.func @transform_3(%arg0: i32, %arg1: i32) -> (i32, i32) {
    %c0_i32 = arith.constant 0 : i32
    %c0_i32_0 = arith.constant 0 : i32
    %c0_i32_1 = arith.constant 0 : i32
    return %c0_i32, %c0_i32_0 : i32, i32
  }
  func.func @transform_4(%arg0: i32, %arg1: i32) -> (i32, i32) {
    %c0_i32 = arith.constant 0 : i32
    %c0_i32_0 = arith.constant 0 : i32
    %c0_i32_1 = arith.constant 0 : i32
    return %c0_i32, %c0_i32_0 : i32, i32
  }
  func.func @transform_5(%arg0: i32, %arg1: i32) -> (i32, i32) {
    %c0_i32 = arith.constant 0 : i32
    %c0_i32_0 = arith.constant 0 : i32
    return %c0_i32, %arg1 : i32, i32
  }
  func.func @transform_6(%arg0: i32, %arg1: i32) -> (i32, i32) {
    %c0_i32 = arith.constant 0 : i32
    %c0_i32_0 = arith.constant 0 : i32
    return %c0_i32, %arg1 : i32, i32
  }
  func.func @transform_7(%arg0: i32, %arg1: i32) -> (i32, i32) {
    %c0_i32 = arith.constant 0 : i32
    return %arg0, %arg1 : i32, i32
  }
}

</mosaic_0001>

<bundles_post_ra>
// kernel: tpu_custom_call.1
= control target key start
LH: loop header
LB: loop body
LE: loop exit
PB: predicated region body
PF: predicated region fallthrough
CT: control target
= control target key end

     0   :  { %s2226_s0 = inlined_call_operand.hbm [shape: f32[16,128], index: 0, kind: input, shape index: {}]   ;;  %s2227_s1 = inlined_call_operand.hbm [shape: f32[128,128], index: 1, kind: input, shape index: {}]   ;;  %s2228_s2 = inlined_call_operand.vmem [shape: f32[1,128], index: 2, kind: input, shape index: {}]   ;;  %s2229_s3 = inlined_call_operand.vmem [shape: f32[1,128], index: 3, kind: input, shape index: {}]   ;;  %s2230_s4 = inlined_call_operand.vmem [shape: f32[1,128], index: 4, kind: input, shape index: {}]   ;;  %s2231_s5 = inlined_call_operand.hbm [shape: f32[128,2048], index: 5, kind: input, shape index: {}]   ;;  %s2232_s6 = inlined_call_operand.hbm [shape: f32[1,2048], index: 6, kind: input, shape index: {}]   ;;  %s2233_s7 = inlined_call_operand.hbm [shape: f32[16,2048], index: 7, kind: output, shape index: {}]  }
   0x1   :  { %2242 = sst [smem:[#allocation22_spill]] %s2226_s0 }
   0x2   :  { %2243 = sst [smem:[#allocation23_spill]] %s2227_s1 }
   0x3   :  { %2244 = sst [smem:[#allocation24_spill]] %s2228_s2 }
   0x4   :  { %2245 = sst [smem:[#allocation25_spill]] %s2229_s3 }
   0x5   :  { %2246 = sst [smem:[#allocation26_spill]] %s2230_s4 }
   0x6   :  { %2247 = sst [smem:[#allocation27_spill]] %s2231_s5 }
   0x7   :  { %2248 = sst [smem:[#allocation28_spill]] %s2232_s6 }
   0x8   :  { %2249 = sst [smem:[#allocation29_spill]] %s2233_s7 }
   0x9   :  { %12 = vsyncpa [#allocation4], 0 }
   0xa   :  { %14 = vsyncpa [#allocation4 + $0x1], 0 }
   0xb   :  { %15 = vsyncpa [#allocation7], 0 }
   0xc   :  { %16 = vsyncpa [#allocation5], 0 }
   0xd   :  { %18 = vsyncpa [#allocation5 + $0x1], 0  ;;  %s1731_s24 = smov 0   ;;  %s1733_s25 = smov 0  }
   0xe   :  { %s1735_s26 = smov 0   ;;  %s1737_s27 = smov 0  }
   0xf   :  { %s1739_s28 = smov 0   ;;  %s1741_s29 = smov 0  }
  0x10   :  { %s1743_s30 = smov 0   ;;  %s1745_s8 = smov 0  }
  0x11   :  { %s1747_s9 = smov 0   ;;  %s1749_s10 = smov 0  }
  0x12   :  { %s1751_s11 = smov 0   ;;  %s1753_s12 = smov 0  }
  0x13   :  { %s1755_s13 = smov 0   ;;  %s1757_s14 = smov 0  }
  0x14 LB: > { %2250 = sst [smem:[#allocation15_spill]] %s1623_s24  ;;  %s33_s15 = sadd.s32 1, %s1667_s12  ;;  %s1675_s14 = sphi %s1757_s14, %s24_s14   ;;  %s1671_s13 = sphi %s1755_s13, %s2290_s13   ;;  %s1667_s12 = sphi %s1753_s12, %s2301_s12   ;;  %s1663_s11 = sphi %s1751_s11, %s2288_s11   ;;  %s1659_s10 = sphi %s1749_s10, %s2300_s10   ;;  %s1655_s9 = sphi %s1747_s9, %s2299_s9   ;;  %s1651_s8 = sphi %s1745_s8, %s2298_s8   ;;  %s1647_s30 = sphi %s1743_s30, %s2297_s30   ;;  %s1643_s29 = sphi %s1741_s29, %s2296_s29   ;;  %s1639_s28 = sphi %s1739_s28, %s2295_s28   ;;  %s1635_s27 = sphi %s1737_s27, %s2294_s27   ;;  %s1631_s26 = sphi %s1735_s26, %s2293_s26   ;;  %s1627_s25 = sphi %s1733_s25, %s2292_s25   ;;  %s1623_s24 = sphi %s1731_s24, %s2291_s24  }
  0x15   : > { %2251 = sst [smem:[#allocation16_spill]] %s1659_s10  ;;  %s36_s16 = sadd.s32 1, %s1671_s13 }
  0x16   : > { %2252 = sst [smem:[#allocation17_spill]] %s1663_s11  ;;  %p34_p0 = scmp.ge.s32.totalorder %s33_s15, 2 }
  0x17   : > { %2253 = sst [smem:[#allocation18_spill]] %s1671_s13  ;;  %s43_s17 = sadd.s32 1, %s1655_s9 }
  0x18   : > { %p50_p1 = scmp.ne.s32.totalorder %s1655_s9, %s1651_s8  ;;  %p51_p2 = scmp.eq.s32.totalorder %s1675_s14, 0 }
  0x19   : > { %s2303_s15 = smov (%p34_p0, %s33_s15), 0  ;;  %s2305_s16 = smov (!%p34_p0, %s36_s16), %s1671_s13 }
  0x1a   : > { %2254 = sst [smem:[#allocation19_spill]] %s2303_s15  ;;  %p1812_p3 = por %p51_p2, %p50_p1 }
  0x1b   : > { %p56_p4 = scmp.ne.s32.totalorder %s1651_s8, %s1647_s30  ;;  %p38_p5 = scmp.ge.s32.totalorder %s2305_s16, 2 }
  0x1c   : > { %s150_s19 = ssub.s32 %s1667_s12, %s2303_s15  ;;  %s153_s20 = sadd.s32 1, %s1643_s29 }
  0x1d   : > { %p151_p6 = scmp.eq.s32.totalorder %s150_s19, 0  ;;  %s2307_s16 = smov (%p38_p5, %s2305_s16), 0 }
  0x1e   : > { %2256 = sst [smem:[#allocation20_spill]] %s2307_s16  ;;  %s40_s22 = ssub.s32 %s1671_s13, %s2307_s16 }
  0x1f   : > { %s1824_s21 = scalar_select %p151_p6, %s1643_s29, %s153_s20  }
  0x20   : > { %p160_p7 = scmp.ne.s32.totalorder %s1643_s29, %s1639_s28  ;;  %p41_p8 = scmp.eq.s32.totalorder %s40_s22, 0 }
  0x21   : > { %2257 = sst [smem:[#allocation21_spill]] %s1824_s21  ;;  %p166_p9 = scmp.ne.s32.totalorder %s1639_s28, %s1635_s27 }
  0x22   : > { %p1834_p10 = por %p160_p7, %p51_p2  ;;  %s204_s15 = sor.u32 %s150_s19, %s40_s22 }
  0x23   : > { %s1839_s7 = scalar_select %p41_p8, %s1655_s9, %s43_s17  }
  0x24   : > { %p205_p11 = scmp.eq.s32.totalorder %s204_s15, 0  ;;  %s207_s11 = sadd.s32 1, %s1631_s26 }
  0x25   : > { %p1282_p12 = scmp.lt.s32.totalorder %s1675_s14, 4  ;;  %s266_s16 = sand.u32 1, %s1675_s14  }
  0x26   : > { %s1844_s20 = scalar_select %p205_p11, %s1631_s26, %s207_s11  }
  0x27   : > { %s268_s21 = sand.u32 1, %s1655_s9   ;;  %s1174_s3 = sshll.u32 %s1671_s13, 7 }
  0x28   : > { %s1173_s4 = sshll.u32 %s268_s21, 3  ;;  %s2259_s0 = sld [smem:[#allocation22_spill]] }
  0x29   : > { %s270_s6 = scalar_lea.vmem [#allocation3], %s1173_s4  ;;  %p1854_p13 = pnand %p1282_p12, %p1812_p3 }
  0x2a   : > { %s277_s24 = sshll.u32 %s270_s6, 4  ;;  %p1860_p0 = pnand %p1282_p12, %p1834_p10  ;;  %s278_s24 = int_to_ptr.vmem [resolvable:$true] %s277_s24 }
  0x2b   : > { %s286_s15 = sand.u32 1, %s1643_s29   ;;  %s1867_s21 = scalar_lea.sflag [#allocation4], %s266_s16 }
  0x2c   : > { %s1175_s19 = sshll.u32 %s286_s15, 10  ;;  %p1415_p1 = pneg %p1854_p13 }
  0x2d   : > { %s1426_s2 = scalar_lea.vmem %s278_s24, 128 }
  0x2e   : > { %s275_s1 = scalar_lea.hbm %s2259_s0, %s1174_s3  ;;  %p1427_p2 = scmp.ne.s32.totalorder %s278_s24, %s1426_s2 }
  0x2f   : > { %s1677_s3 = smov [#allocation3]  }
  0x30   : > { %p1429_p5 = pnand %p1427_p2, %p1415_p1  ;;  %s1431_s4 = sshll.u32 %s1677_s3, 4  ;;  %s1432_s4 = int_to_ptr.vmem [resolvable:$false] %s1431_s4 }
  0x31   : > { %s1433_s6 = scalar_lea.vmem %s1432_s4, 256  ;;  %p1434_p6 = scmp.lt.s32.totalorder %s278_s24, %s1432_s4 }
  0x32   : > { %p1430_p3 = pneg %p1429_p5  ;;  %p1435_p7 = scmp.lt.s32.totalorder %s1433_s6, %s1426_s2 }
  0x34   : > { %p1436_p8 = por %p1435_p7, %p1434_p6 }
  0x36   : > { %p1437_p10 = pnand %p1436_p8, %p1430_p3 }
  0x38   : > { %1440 = shalt.err (!%p1437_p10)
}
  0x39   : > { %1270 = dma.hbm_to_vmem [thread:$0]  (!%p1854_p13), %s275_s1, 128, %s278_s24, %s1867_s21  }
  0x3a   : > { %s1197_s10 = sshll.u32 %s1667_s12, 10  ;;  %s288_s16 = scalar_lea.vmem [#allocation8], %s1175_s19 }
  0x3b   : > { %s295_s18 = sshll.u32 %s288_s16, 4  ;;  %s2262_s5 = sld [smem:[#allocation27_spill]]  ;;  %s296_s18 = int_to_ptr.vmem [resolvable:$true] %s295_s18 }
  0x3c   : > { %p2237_p11 = pneg %p1860_p0  ;;  %s1454_s2 = scalar_lea.vmem %s296_s18, 16384 }
  0x3d   : > { %p1455_p12 = scmp.ne.s32.totalorder %s296_s18, %s1454_s2  ;;  %s1678_s17 = smov [#allocation8]  }
  0x3e   : > { %s1459_s4 = sshll.u32 %s1678_s17, 4  ;;  %s1460_s4 = int_to_ptr.vmem [resolvable:$false] %s1459_s4 }
  0x3f   : > { %p1457_p1 = pnand %p1455_p12, %p2237_p11  ;;  %s1461_s1 = scalar_lea.vmem %s1460_s4, 32768 }
  0x40   : > { %p1462_p13 = scmp.lt.s32.totalorder %s296_s18, %s1460_s4  ;;  %p1463_p5 = scmp.lt.s32.totalorder %s1461_s1, %s1454_s2 }
  0x41   : > { %s294_s3 = scalar_lea.hbm %s2262_s5, %s1197_s10  ;;  %p1458_p2 = pneg %p1457_p1 }
  0x42   : > { %p1464_p3 = por %p1463_p5, %p1462_p13 }
  0x44   : > { %p1465_p6 = pnand %p1464_p3, %p1458_p2 }
  0x46   : > { %1468 = shalt.err (!%p1465_p6)
}
  0x47   : > { %s1679_s24 = smov 2048   ;;  %s2263_s19 = sld [smem:[#allocation15_spill]] }
  0x48   : > { %s1680_s6 = smov 1024   ;;  %s1681_s10 = smov 64  }
  0x49   : > { %1273 = dma.hbm_to_vmem [thread:$0]  (!%p1860_p0), %s294_s3, 16384, %s296_s18, %s1867_s21, %s1679_s24, %s1680_s6, %s1681_s10  }
  0x4a   : > { %s1887_s16 = sadd.s32 4294967295, %s1675_s14   ;;  %s1169_s22 = sadd.s32 4294967294, %s1675_s14  }
  0x4b   : > { %p2238_p7 = scmp.eq.s32.totalorder %s1887_s16, 0  ;;  %p217_p8 = scmp.ne.s32.totalorder %s1631_s26, %s1627_s25 }
  0x4c   : > { %p218_p10 = scmp.eq.s32.totalorder %s1887_s16, 3  ;;  %p224_p5 = scmp.eq.s32.totalorder %s1169_s22, 3 }
  0x4d   : > { %p1899_p12 = por %p2238_p7, %p56_p4  ;;  %p1908_p1 = por %p166_p9, %p2238_p7 }
  0x4e   : > { %p1912_p2 = por %p218_p10, %p217_p8  ;;  %p223_p13 = scmp.ne.s32.totalorder %s1627_s25, %s2263_s19 }
  0x4f   : > { %s2265_s18 = scalar_select %p1908_p1, 1, 0 }
  0x50   : > { %s2266_s3 = scalar_select %p1912_p2, 1, 0 }
  0x51   : > { %p1170_p3 = scmp.ge.s32.totalorder %s1675_s14, 1  ;;  %p231_p6 = scmp.lt.s32.totalorder %s1675_s14, 5 }
  0x52   : > { %p1920_p11 = por %p224_p5, %p223_p13  ;;  %s1682_s27 = smov [#allocation6]  }
  0x53   : > { %p1924_p4 = pnand %p1170_p3, %p231_p6  ;;  %s243_s17 = sshll.u32 %s1682_s27, 4  ;;  %s244_s17 = int_to_ptr.vmem [resolvable:$true] %s243_s17 }
  0x54   : > { %s2267_s30 = scalar_select %p1920_p11, 1, 0 }
  0x55   : > { %p1263_p9 = pneg %p1924_p4  ;;  %s1178_s4 = sshll.u32 %s286_s15, 3 }
  0x56   : > { %s1198_s1 = sshll.u32 %s1667_s12, 7  ;;  %s2270_s10 = sld [smem:[#allocation28_spill]] }
  0x57   : > { %p1935_p8 = pnand %p1263_p9, %p2238_p7  ;;  %s309_s0 = scalar_lea.vmem [#allocation9], %s1178_s4 }
  0x58   : > { %s317_s5 = sshll.u32 %s309_s0, 4  ;;  %s1480_s27 = scalar_lea.vmem %s244_s17, 2048  ;;  %s318_s5 = int_to_ptr.vmem [resolvable:$true] %s317_s5 }
  0x59   : > { %p1471_p10 = pneg %p1935_p8  ;;  %p1481_p13 = scmp.ne.s32.totalorder %s244_s17, %s1480_s27 }
  0x5a   : > { %p1488_p6 = scmp.lt.s32.totalorder %s244_s17, %s244_s17  ;;  %p1489_p9 = scmp.lt.s32.totalorder %s1480_s27, %s1480_s27 }
  0x5b   : > { %p1483_p5 = pnand %p1481_p13, %p1471_p10 }
  0x5c   : > { %s1942_s22 = scalar_lea.hbm %s2270_s10, %s1198_s1  ;;  %p1490_p7 = por %p1489_p9, %p1488_p6 }
  0x5d   : > { %p1484_p3 = pneg %p1483_p5 }
  0x5f   : > { %p1491_p11 = pnand %p1490_p7, %p1484_p3 }
  0x61   : > { %1494 = shalt.err (!%p1491_p11)
}
  0x62   : > { %s1683_s15 = smov 128   ;;  %s1684_s19 = smov 8  }
  0x63   : > { %s2271_s0 = sld [smem:[#allocation23_spill]]  ;;  %s1508_s6 = scalar_lea.vmem %s318_s5, 128 }
  0x64   : > { %p1509_p2 = scmp.ne.s32.totalorder %s318_s5, %s1508_s6  ;;  %p2272_p1 = pneg %p1860_p0 }
  0x65   : > { %s1685_s10 = smov [#allocation9]  }
  0x66   : > { %p1511_p10 = pnand %p1509_p2, %p2272_p1  ;;  %s1513_s27 = sshll.u32 %s1685_s10, 4  ;;  %s1514_s27 = int_to_ptr.vmem [resolvable:$false] %s1513_s27 }
  0x67   : > { %s1515_s13 = scalar_lea.vmem %s1514_s27, 256  ;;  %p1516_p11 = scmp.lt.s32.totalorder %s318_s5, %s1514_s27 }
  0x68   : > { %p1512_p13 = pneg %p1511_p10  ;;  %p1517_p7 = scmp.lt.s32.totalorder %s1515_s13, %s1508_s6 }
  0x69   : > { %1266 = dma.hbm_to_vmem [thread:$0]  (!%p1935_p8), %s2271_s0, 2048, %s244_s17, [#allocation7], %s1683_s15, %s1683_s15, %s1684_s19  }
  0x6a   : > { %p1518_p5 = por %p1517_p7, %p1516_p11 }
  0x6c   : > { %p1519_p3 = pnand %p1518_p5, %p1512_p13 }
  0x6e   : > { %1522 = shalt.err (!%p1519_p3)
}
  0x6f   : > { %1276 = dma.hbm_to_vmem [thread:$0]  (!%p1860_p0), %s1942_s22, 128, %s318_s5, %s1867_s21  }
  0x70   : > { %326 = sbr.rel (%p1924_p4) target bundleno = 867 (0x363), region = 48  ;;  %s328_s17 = sand.u32 (!%p1924_p4), 1, %s1887_s16  }
  0x71   : > { %s330_s24 = sand.u32 (!%p1924_p4), 1, %s1651_s8   ;;  %s329_s13 = scalar_lea.sflag (!%p1924_p4), [#allocation4], %s328_s17 }
  0x72   : > { %s1962_s15 = sshll.u32 (!%p1924_p4), %s330_s24, 3 }
  0x73   : > { %s332_s19 = scalar_lea.vmem (!%p1924_p4), [#allocation3], %s1962_s15 }
  0x75   : > { %1606 = dma.done.wait (%p1899_p12), %s329_s13, 128  }
  0x76   : > { %1608 = vsyncadd (%p1899_p12), %s329_s13, 4294967168  ;;  %p2273_p0 = scmp.eq.s32.totalorder %s1887_s16, 0 }
  0x78   : > { %1610 = dma.done.wait (%p2273_p0), [#allocation7], 2048   ;;  %p2274_p1 = pmov %p2273_p0 }
  0x79   : > { %s343_s5 = sand.u32 1, %s1639_s28   ;;  %p2275_p2 = scmp.ne.s32.totalorder %s2265_s18, 0 }
  0x7a   : > { %1612 = vsyncadd (%p2274_p1), [#allocation7], 4294965248  ;;  %s1184_s11 = sshll.u32 %s343_s5, 10 }
  0x7b   : > { %s1974_s21 = scalar_lea.vmem [#allocation8], %s1184_s11 }
  0x7c   : > { %1614 = dma.done.wait (%p2275_p2), %s329_s13, 16512  }
  0x7d   : > { %1616 = vsyncadd (%p2275_p2), %s329_s13, 4294950784  ;;  %s1980_s23 = sshll.u32 %s343_s5, 3  ;;  %s392_s2 = sand.u32 1, %s1627_s25  }
  0x7e   : > { %s1186_s16 = sshll.u32 %s392_s2, 6  ;;  %s354_s22 = scalar_lea.vmem [#allocation9], %s1980_s23 }
  0x7f   : > { %s1986_s1 = scalar_lea.vmem [#allocation10], %s1186_s16  ;;  %s2276_s4 = sld [smem:[#allocation16_spill]] }
  0x85   : > { %p1187_p12 = scmp.ne.s32.totalorder %s2276_s4, 0 }
  0x86   : > { %s2277_s6 = sld [smem:[#allocation24_spill]] (!%p1187_p12) }
  0x87   : > { %401 = sbr.rel (%p1187_p12) target bundleno = 589 (0x24d), region = 68  ;;  %s2278_s17 = sld [smem:[#allocation25_spill]] (!%p1187_p12) }
  0x88   : > { %s2279_s13 = sld [smem:[#allocation26_spill]] (!%p1187_p12) }
  0x8c   : > { %v418_v0 = vld [vmem:[#allocation6 + $0x78] sm:$0xff]  ;;  %v1686_v1 = vmov 0.0   ;;  %v417_v2 = vld [vmem:[#allocation6 + $0x70] sm:$0xff]  ;;  %vm1687_vm0 = vmmov 0   ;;  %v416_v3 = vld [vmem:[#allocation6 + $0x68] sm:$0xff]  ;;  %v1688_v42 = vmov -1.0  }
  0x8d   : > { %1216 = vmatprep.subr.mxu0 %v1686_v1  ;;  %1248 = vmatprep.mubr.msk.f32.mxu0 %vm1687_vm0, %v1686_v1  ;;  %v415_v4 = vld [vmem:[#allocation6 + $0x60] sm:$0xff]  ;;  %v414_v5 = vld [vmem:[#allocation6 + $0x58] sm:$0xff]  ;;  %v413_v6 = vld [vmem:[#allocation6 + $0x50] sm:$0xff] }
  0x8e   : > { %1217 = vmatpush3.msra.mxu0 %v418_v0  ;;  %v412_v7 = vld [vmem:[#allocation6 + $0x48] sm:$0xff]  ;;  %v411_v8 = vld [vmem:[#allocation6 + $0x40] sm:$0xff]  ;;  %v410_v9 = vld [vmem:[#allocation6 + $0x38] sm:$0xff] }
  0x8f   : > { %1218 = vmatprep.subr.mxu0 %v1686_v1  ;;  %v409_v10 = vld [vmem:[#allocation6 + $0x30] sm:$0xff]  ;;  %v408_v11 = vld [vmem:[#allocation6 + $0x28] sm:$0xff]  ;;  %v407_v12 = vld [vmem:[#allocation6 + $0x20] sm:$0xff] }
  0x90   : > { %1219 = vmatpush3.msra.mxu0 %v417_v2  ;;  %v406_v13 = vld [vmem:[#allocation6 + $0x18] sm:$0xff]  ;;  %v405_v14 = vld [vmem:[#allocation6 + $0x10] sm:$0xff]  ;;  %v404_v15 = vld [vmem:[#allocation6 + $0x8] sm:$0xff] }
  0x91   : > { %1220 = vmatprep.subr.mxu0 %v1686_v1  ;;  %v403_v16 = vld [vmem:[#allocation6] sm:$0xff]  ;;  %v402_v17 = vld [vmem:[%s332_s19] sm:$0xff]  ;;  %v1188_v18 = vld [vmem:[%s2277_s6] ss:$0 sm:$0xff] }
  0x92   : > { %1221 = vmatpush3.msra.mxu0 %v416_v3  ;;  %v1189_v59 = vld [vmem:[%s2278_s17] ss:$0 sm:$0xff] }
  0x93   : > { %1222 = vmatprep.subr.mxu0 %v1686_v1  ;;  %v1190_v61 = vld [vmem:[%s2279_s13] ss:$0 sm:$0xff] }
  0x94   : > { %1223 = vmatpush3.msra.mxu0 %v415_v4 }
  0x95   : > { %1224 = vmatprep.subr.mxu0 %v1686_v1 }
  0x96   : > { %1225 = vmatpush3.msra.mxu0 %v414_v5 }
  0x97   : > { %1226 = vmatprep.subr.mxu0 %v1686_v1 }
  0x98   : > { %1227 = vmatpush3.msra.mxu0 %v413_v6 }
  0x99   : > { %1228 = vmatprep.subr.mxu0 %v1686_v1 }
  0x9a   : > { %1229 = vmatpush3.msra.mxu0 %v412_v7 }
  0x9b   : > { %1230 = vmatprep.subr.mxu0 %v1686_v1 }
  0x9c   : > { %1231 = vmatpush3.msra.mxu0 %v411_v8 }
  0x9d   : > { %1232 = vmatprep.subr.mxu0 %v1686_v1 }
  0x9e   : > { %1233 = vmatpush3.msra.mxu0 %v410_v9 }
  0x9f   : > { %1234 = vmatprep.subr.mxu0 %v1686_v1 }
  0xa0   : > { %1235 = vmatpush3.msra.mxu0 %v409_v10 }
  0xa1   : > { %1236 = vmatprep.subr.mxu0 %v1686_v1 }
  0xa2   : > { %1237 = vmatpush3.msra.mxu0 %v408_v11 }
  0xa3   : > { %1238 = vmatprep.subr.mxu0 %v1686_v1 }
  0xa4   : > { %1239 = vmatpush3.msra.mxu0 %v407_v12 }
  0xa5   : > { %1240 = vmatprep.subr.mxu0 %v1686_v1 }
  0xa6   : > { %1241 = vmatpush3.msra.mxu0 %v406_v13 }
  0xa7   : > { %1242 = vmatprep.subr.mxu0 %v1686_v1 }
  0xa8   : > { %1243 = vmatpush3.msra.mxu0 %v405_v14 }
  0xa9   : > { %1244 = vmatprep.subr.mxu0 %v1686_v1 }
  0xaa   : > { %1245 = vmatpush3.msra.mxu0 %v404_v15 }
  0xab   : > { %1246 = vmatprep.subr.mxu0 %v1686_v1 }
  0xac   : > { %1247 = vmatpush3.msra.mxu0 %v403_v16 }
  0xad   : > { %1249 = vmatmul.mubr.f32.vlgmr.msra.gmra.mxu0 %v402_v17 }
 0x16d   : > { %v492_v19 = vpop.f32.mrf.mxu0 }
 0x16e   : > { %v493_v20 = vadd.f32 %v1188_v18, %v492_v19 }
 0x16f   : > { %v1250_v21 = vpop.f32.mrf.mxu0 }
 0x170   : > { %v497_v22 = vmul.f32 0.70710677, %v493_v20  ;;  %v496_v45 = vmul.f32 0.5, %v493_v20 }
 0x172   : > { %v500_v23 = vand.u32 2147483647, %v497_v22  ;;  %vm498_vm1 = vcmp.ge.f32.partialorder %v497_v22, 0.0 }
 0x173   : > { %v499_v43 = vsel %vm498_vm1, 1.0, %v1688_v42 }
 0x174   : > { %v501_v24 = vmul.f32 0.3275911, %v500_v23  ;;  %v514_v26 = vsub.f32 0.0, %v500_v23 }
 0x176   : > { %v502_v25 = vadd.f32 1.0, %v501_v24  ;;  %v515_v27 = vmul.f32 %v514_v26, %v500_v23 }
 0x178   : > { %1407 = vrcp.f32 %v502_v25  ;;  %v516_v29 = vmul.f32 1.442695, %v515_v27 }
 0x17a   : > { %1409 = vpow2.f32 %v516_v29 }
 0x185   : > { %v1408_v28 = vpop.eup %1407 }
 0x186   : > { %v505_v30 = vmul.f32 1.0614054, %v1408_v28 }
 0x187   : > { %v1410_v39 = vpop.eup %1409 }
 0x188   : > { %v506_v31 = vadd.f32 -1.4531521, %v505_v30 }
 0x18a   : > { %v507_v32 = vmul.f32 %v1408_v28, %v506_v31 }
 0x18c   : > { %v508_v33 = vadd.f32 1.4214138, %v507_v32 }
 0x18e   : > { %v509_v34 = vmul.f32 %v1408_v28, %v508_v33 }
 0x190   : > { %v510_v35 = vadd.f32 -0.28449672, %v509_v34 }
 0x192   : > { %v511_v36 = vmul.f32 %v1408_v28, %v510_v35 }
 0x194   : > { %v512_v37 = vadd.f32 0.2548296, %v511_v36 }
 0x196   : > { %v513_v38 = vmul.f32 %v1408_v28, %v512_v37 }
 0x198   : > { %v518_v40 = vmul.f32 %v1410_v39, %v513_v38 }
 0x19a   : > { %v519_v41 = vsub.f32 1.0, %v518_v40 }
 0x19c   : > { %v520_v44 = vmul.f32 %v519_v41, %v499_v43 }
 0x19e   : > { %v521_v46 = vadd.f32 1.0, %v520_v44 }
 0x1a0   : > { %v522_v47 = vmul.f32 %v521_v46, %v496_v45 }
 0x1a2   : > { %523 = vadd.xlane.f32.xlu0 %v522_v47  ;;  %v526_v48 = vmul.f32 %v522_v47, %v522_v47 }
 0x1a6   : > { %527 = vadd.xlane.f32.xlu0 %v526_v48 }
 0x22b   : > { %v524_v49 = vpop.xlane.xlu0 %523 }
 0x22c   : > { %v525_v50 = vmul.f32 0.0078125, %v524_v49 }
 0x22e   : > { %v530_v52 = vmul.f32 %v525_v50, %v525_v50  ;;  %v533_v57 = vsub.f32 %v522_v47, %v525_v50 }
 0x22f   : > { %v528_v51 = vpop.xlane.xlu0 %527 }
 0x230   : > { %v529_v53 = vmul.f32 0.0078125, %v528_v51 }
 0x232   : > { %v531_v54 = vsub.f32 %v529_v53, %v530_v52 }
 0x234   : > { %v532_v55 = vmax.f32 %v531_v54, 0.0 }
 0x236   : > { %v534_v56 = vadd.f32 1e-12, %v532_v55 }
 0x238   : > { %1411 = vrsqrt.f32 %v534_v56 }
 0x245   : > { %v1412_v58 = vpop.eup %1411 }
 0x246   : > { %v536_v60 = vmul.f32 %v1412_v58, %v533_v57 }
 0x248   : > { %v544_v62 = vmul.f32 %v1189_v59, %v536_v60 }
 0x24a   : > { %v552_v63 = vadd.f32 %v1190_v61, %v544_v62 }
 0x24c   : > { %553 = vst [vmem:[#allocation2] sm:$0xff] %v552_v63 }
 0x24d PF: > { %v676_v0 = vld [vmem:[%s1974_s21 + $0x3c8] sm:$0xff]  ;;  %v678_v1 = vld [vmem:[%s1974_s21 + $0x3d8] sm:$0xff]  ;;  %v675_v2 = vld [vmem:[%s1974_s21 + $0x3c0] sm:$0xff]  ;;  %s2280_s19 = sld [smem:[#allocation16_spill]]  ;;  %s1018_s10 = scalar_lea.sflag [#allocation5], %s392_s2 }
 0x24e   : > { %725 = vmatprep.subr.mxu0 %v676_v0  ;;  %796 = vmatprep.subr.mxu1 %v678_v1  ;;  %v677_v3 = vld [vmem:[%s1974_s21 + $0x3d0] sm:$0xff]  ;;  %v668_v4 = vld [vmem:[%s1974_s21 + $0x388] sm:$0xff]  ;;  %v670_v5 = vld [vmem:[%s1974_s21 + $0x398] sm:$0xff]  ;;  %v1689_v1 = vmov 0.0   ;;  %s2281_s5 = sld [smem:[#allocation17_spill]]  ;;  %p2283_p8 = scmp.ne.s32.totalorder %s2266_s3, 0 }
 0x24f   : > { %726 = vmatpush1.msra.mxu0 %v675_v2  ;;  %797 = vmatpush1.msra.mxu1 %v677_v3  ;;  %v667_v6 = vld [vmem:[%s1974_s21 + $0x380] sm:$0xff]  ;;  %v669_v7 = vld [vmem:[%s1974_s21 + $0x390] sm:$0xff]  ;;  %v660_v8 = vld [vmem:[%s1974_s21 + $0x348] sm:$0xff]  ;;  %s2282_s0 = sld [smem:[#allocation29_spill]]  ;;  %s1690_s17 = smov [#allocation10]  }
 0x250   : > { %727 = vmatprep.subr.mxu0 %v668_v4  ;;  %798 = vmatprep.subr.mxu1 %v670_v5  ;;  %v662_v9 = vld [vmem:[%s1974_s21 + $0x358] sm:$0xff]  ;;  %v659_v10 = vld [vmem:[%s1974_s21 + $0x340] sm:$0xff]  ;;  %v661_v11 = vld [vmem:[%s1974_s21 + $0x350] sm:$0xff]  ;;  %s1527_s24 = sshll.u32 %s1690_s17, 4  ;;  %s1528_s24 = int_to_ptr.vmem [resolvable:$false] %s1527_s24 }
 0x251   : > { %728 = vmatpush1.msra.mxu0 %v667_v6  ;;  %799 = vmatpush1.msra.mxu1 %v669_v7  ;;  %v652_v12 = vld [vmem:[%s1974_s21 + $0x308] sm:$0xff]  ;;  %v654_v13 = vld [vmem:[%s1974_s21 + $0x318] sm:$0xff]  ;;  %v651_v14 = vld [vmem:[%s1974_s21 + $0x300] sm:$0xff]  ;;  %s1529_s15 = scalar_lea.vmem %s1528_s24, 2048 }
 0x252   : > { %729 = vmatprep.subr.mxu0 %v660_v8  ;;  %800 = vmatprep.subr.mxu1 %v662_v9  ;;  %v653_v15 = vld [vmem:[%s1974_s21 + $0x310] sm:$0xff]  ;;  %v644_v16 = vld [vmem:[%s1974_s21 + $0x2c8] sm:$0xff]  ;;  %v646_v17 = vld [vmem:[%s1974_s21 + $0x2d8] sm:$0xff] }
 0x253   : > { %730 = vmatpush1.msra.mxu0 %v659_v10  ;;  %801 = vmatpush1.msra.mxu1 %v661_v11  ;;  %v643_v18 = vld [vmem:[%s1974_s21 + $0x2c0] sm:$0xff]  ;;  %v645_v19 = vld [vmem:[%s1974_s21 + $0x2d0] sm:$0xff]  ;;  %v636_v20 = vld [vmem:[%s1974_s21 + $0x288] sm:$0xff]  ;;  %s1192_s11 = sshll.u32 %s2280_s19, 3 }
 0x254   : > { %731 = vmatprep.subr.mxu0 %v652_v12  ;;  %802 = vmatprep.subr.mxu1 %v654_v13  ;;  %v638_v21 = vld [vmem:[%s1974_s21 + $0x298] sm:$0xff]  ;;  %v635_v22 = vld [vmem:[%s1974_s21 + $0x280] sm:$0xff]  ;;  %v637_v23 = vld [vmem:[%s1974_s21 + $0x290] sm:$0xff] }
 0x255   : > { %732 = vmatpush1.msra.mxu0 %v651_v14  ;;  %803 = vmatpush1.msra.mxu1 %v653_v15  ;;  %v628_v24 = vld [vmem:[%s1974_s21 + $0x248] sm:$0xff]  ;;  %v630_v25 = vld [vmem:[%s1974_s21 + $0x258] sm:$0xff]  ;;  %v627_v26 = vld [vmem:[%s1974_s21 + $0x240] sm:$0xff] }
 0x256   : > { %733 = vmatprep.subr.mxu0 %v644_v16  ;;  %804 = vmatprep.subr.mxu1 %v646_v17  ;;  %v629_v27 = vld [vmem:[%s1974_s21 + $0x250] sm:$0xff]  ;;  %v620_v28 = vld [vmem:[%s1974_s21 + $0x208] sm:$0xff]  ;;  %v622_v29 = vld [vmem:[%s1974_s21 + $0x218] sm:$0xff] }
 0x257   : > { %734 = vmatpush1.msra.mxu0 %v643_v18  ;;  %805 = vmatpush1.msra.mxu1 %v645_v19  ;;  %v619_v30 = vld [vmem:[%s1974_s21 + $0x200] sm:$0xff]  ;;  %v621_v31 = vld [vmem:[%s1974_s21 + $0x210] sm:$0xff]  ;;  %v612_v32 = vld [vmem:[%s1974_s21 + $0x1c8] sm:$0xff] }
 0x258   : > { %735 = vmatprep.subr.mxu0 %v636_v20  ;;  %806 = vmatprep.subr.mxu1 %v638_v21  ;;  %v614_v33 = vld [vmem:[%s1974_s21 + $0x1d8] sm:$0xff]  ;;  %v611_v34 = vld [vmem:[%s1974_s21 + $0x1c0] sm:$0xff]  ;;  %v613_v35 = vld [vmem:[%s1974_s21 + $0x1d0] sm:$0xff] }
 0x259   : > { %736 = vmatpush1.msra.mxu0 %v635_v22  ;;  %807 = vmatpush1.msra.mxu1 %v637_v23  ;;  %v604_v36 = vld [vmem:[%s1974_s21 + $0x188] sm:$0xff]  ;;  %v606_v37 = vld [vmem:[%s1974_s21 + $0x198] sm:$0xff]  ;;  %v603_v38 = vld [vmem:[%s1974_s21 + $0x180] sm:$0xff] }
 0x25a   : > { %737 = vmatprep.subr.mxu0 %v628_v24  ;;  %808 = vmatprep.subr.mxu1 %v630_v25  ;;  %v605_v39 = vld [vmem:[%s1974_s21 + $0x190] sm:$0xff]  ;;  %v596_v40 = vld [vmem:[%s1974_s21 + $0x148] sm:$0xff]  ;;  %v598_v41 = vld [vmem:[%s1974_s21 + $0x158] sm:$0xff] }
 0x25b   : > { %738 = vmatpush1.msra.mxu0 %v627_v26  ;;  %809 = vmatpush1.msra.mxu1 %v629_v27  ;;  %v595_v42 = vld [vmem:[%s1974_s21 + $0x140] sm:$0xff]  ;;  %v597_v43 = vld [vmem:[%s1974_s21 + $0x150] sm:$0xff]  ;;  %v588_v44 = vld [vmem:[%s1974_s21 + $0x108] sm:$0xff] }
 0x25c   : > { %739 = vmatprep.subr.mxu0 %v620_v28  ;;  %810 = vmatprep.subr.mxu1 %v622_v29  ;;  %v590_v45 = vld [vmem:[%s1974_s21 + $0x118] sm:$0xff]  ;;  %v587_v46 = vld [vmem:[%s1974_s21 + $0x100] sm:$0xff]  ;;  %v589_v47 = vld [vmem:[%s1974_s21 + $0x110] sm:$0xff] }
 0x25d   : > { %740 = vmatpush1.msra.mxu0 %v619_v30  ;;  %811 = vmatpush1.msra.mxu1 %v621_v31  ;;  %v580_v48 = vld [vmem:[%s1974_s21 + $0xc8] sm:$0xff]  ;;  %v582_v49 = vld [vmem:[%s1974_s21 + $0xd8] sm:$0xff]  ;;  %v579_v50 = vld [vmem:[%s1974_s21 + $0xc0] sm:$0xff] }
 0x25e   : > { %741 = vmatprep.subr.mxu0 %v612_v32  ;;  %812 = vmatprep.subr.mxu1 %v614_v33  ;;  %v581_v51 = vld [vmem:[%s1974_s21 + $0xd0] sm:$0xff]  ;;  %v572_v52 = vld [vmem:[%s1974_s21 + $0x88] sm:$0xff]  ;;  %v574_v53 = vld [vmem:[%s1974_s21 + $0x98] sm:$0xff] }
 0x25f   : > { %742 = vmatpush1.msra.mxu0 %v611_v34  ;;  %813 = vmatpush1.msra.mxu1 %v613_v35  ;;  %v571_v54 = vld [vmem:[%s1974_s21 + $0x80] sm:$0xff]  ;;  %v573_v55 = vld [vmem:[%s1974_s21 + $0x90] sm:$0xff]  ;;  %v564_v56 = vld [vmem:[%s1974_s21 + $0x48] sm:$0xff] }
 0x260   : > { %743 = vmatprep.subr.mxu0 %v604_v36  ;;  %814 = vmatprep.subr.mxu1 %v606_v37  ;;  %v566_v57 = vld [vmem:[%s1974_s21 + $0x58] sm:$0xff]  ;;  %v563_v58 = vld [vmem:[%s1974_s21 + $0x40] sm:$0xff]  ;;  %v565_v59 = vld [vmem:[%s1974_s21 + $0x50] sm:$0xff] }
 0x261   : > { %744 = vmatpush1.msra.mxu0 %v603_v38  ;;  %815 = vmatpush1.msra.mxu1 %v605_v39  ;;  %v556_v60 = vld [vmem:[%s1974_s21 + $0x8] sm:$0xff]  ;;  %v558_v61 = vld [vmem:[%s1974_s21 + $0x18] sm:$0xff]  ;;  %v555_v62 = vld [vmem:[%s1974_s21] sm:$0xff] }
 0x262   : > { %745 = vmatprep.subr.mxu0 %v596_v40  ;;  %816 = vmatprep.subr.mxu1 %v598_v41  ;;  %v557_v63 = vld [vmem:[%s1974_s21 + $0x10] sm:$0xff]  ;;  %v2064_v0 = vld [vmem:[#allocation2] sm:$0xff]  ;;  %v682_v3 = vld [vmem:[%s1974_s21 + $0x3f8] sm:$0xff] }
 0x263   : > { %746 = vmatpush1.msra.mxu0 %v595_v42  ;;  %817 = vmatpush1.msra.mxu1 %v597_v43  ;;  %v680_v2 = vld [vmem:[%s1974_s21 + $0x3e8] sm:$0xff]  ;;  %v679_v4 = vld [vmem:[%s1974_s21 + $0x3e0] sm:$0xff]  ;;  %v681_v5 = vld [vmem:[%s1974_s21 + $0x3f0] sm:$0xff] }
 0x264   : > { %747 = vmatprep.subr.mxu0 %v588_v44  ;;  %818 = vmatprep.subr.mxu1 %v590_v45  ;;  %v672_v6 = vld [vmem:[%s1974_s21 + $0x3a8] sm:$0xff]  ;;  %v674_v7 = vld [vmem:[%s1974_s21 + $0x3b8] sm:$0xff]  ;;  %v671_v8 = vld [vmem:[%s1974_s21 + $0x3a0] sm:$0xff] }
 0x265   : > { %748 = vmatpush1.msra.mxu0 %v587_v46  ;;  %819 = vmatpush1.msra.mxu1 %v589_v47  ;;  %v673_v9 = vld [vmem:[%s1974_s21 + $0x3b0] sm:$0xff]  ;;  %v664_v10 = vld [vmem:[%s1974_s21 + $0x368] sm:$0xff]  ;;  %v666_v11 = vld [vmem:[%s1974_s21 + $0x378] sm:$0xff] }
 0x266   : > { %749 = vmatprep.subr.mxu0 %v580_v48  ;;  %820 = vmatprep.subr.mxu1 %v582_v49  ;;  %v663_v12 = vld [vmem:[%s1974_s21 + $0x360] sm:$0xff]  ;;  %v665_v13 = vld [vmem:[%s1974_s21 + $0x370] sm:$0xff]  ;;  %v656_v14 = vld [vmem:[%s1974_s21 + $0x328] sm:$0xff] }
 0x267   : > { %750 = vmatpush1.msra.mxu0 %v579_v50  ;;  %821 = vmatpush1.msra.mxu1 %v581_v51  ;;  %v658_v15 = vld [vmem:[%s1974_s21 + $0x338] sm:$0xff]  ;;  %v655_v16 = vld [vmem:[%s1974_s21 + $0x320] sm:$0xff]  ;;  %v657_v17 = vld [vmem:[%s1974_s21 + $0x330] sm:$0xff] }
 0x268   : > { %751 = vmatprep.subr.mxu0 %v572_v52  ;;  %822 = vmatprep.subr.mxu1 %v574_v53  ;;  %v648_v18 = vld [vmem:[%s1974_s21 + $0x2e8] sm:$0xff]  ;;  %v650_v19 = vld [vmem:[%s1974_s21 + $0x2f8] sm:$0xff]  ;;  %v647_v20 = vld [vmem:[%s1974_s21 + $0x2e0] sm:$0xff] }
 0x269   : > { %752 = vmatpush1.msra.mxu0 %v571_v54  ;;  %823 = vmatpush1.msra.mxu1 %v573_v55  ;;  %v649_v21 = vld [vmem:[%s1974_s21 + $0x2f0] sm:$0xff]  ;;  %v640_v22 = vld [vmem:[%s1974_s21 + $0x2a8] sm:$0xff]  ;;  %v642_v23 = vld [vmem:[%s1974_s21 + $0x2b8] sm:$0xff] }
 0x26a   : > { %753 = vmatprep.subr.mxu0 %v564_v56  ;;  %824 = vmatprep.subr.mxu1 %v566_v57  ;;  %v639_v24 = vld [vmem:[%s1974_s21 + $0x2a0] sm:$0xff]  ;;  %v641_v25 = vld [vmem:[%s1974_s21 + $0x2b0] sm:$0xff]  ;;  %v632_v26 = vld [vmem:[%s1974_s21 + $0x268] sm:$0xff] }
 0x26b   : > { %754 = vmatpush1.msra.mxu0 %v563_v58  ;;  %825 = vmatpush1.msra.mxu1 %v565_v59  ;;  %v634_v27 = vld [vmem:[%s1974_s21 + $0x278] sm:$0xff]  ;;  %v631_v28 = vld [vmem:[%s1974_s21 + $0x260] sm:$0xff]  ;;  %v633_v29 = vld [vmem:[%s1974_s21 + $0x270] sm:$0xff] }
 0x26c   : > { %755 = vmatprep.subr.mxu0 %v556_v60  ;;  %826 = vmatprep.subr.mxu1 %v558_v61  ;;  %v624_v30 = vld [vmem:[%s1974_s21 + $0x228] sm:$0xff]  ;;  %v626_v31 = vld [vmem:[%s1974_s21 + $0x238] sm:$0xff]  ;;  %v623_v32 = vld [vmem:[%s1974_s21 + $0x220] sm:$0xff] }
 0x26d   : > { %756 = vmatpush1.msra.mxu0 %v555_v62  ;;  %789 = vmatprep.mubr.f32.mxu0 %v1689_v1  ;;  %v625_v33 = vld [vmem:[%s1974_s21 + $0x230] sm:$0xff]  ;;  %v616_v34 = vld [vmem:[%s1974_s21 + $0x1e8] sm:$0xff]  ;;  %v618_v35 = vld [vmem:[%s1974_s21 + $0x1f8] sm:$0xff] }
 0x26e   : > { %827 = vmatpush1.msra.mxu1 %v557_v63  ;;  %860 = vmatprep.mubr.f32.mxu1 %v1689_v1  ;;  %v615_v36 = vld [vmem:[%s1974_s21 + $0x1e0] sm:$0xff]  ;;  %v617_v37 = vld [vmem:[%s1974_s21 + $0x1f0] sm:$0xff]  ;;  %v608_v38 = vld [vmem:[%s1974_s21 + $0x1a8] sm:$0xff] }
 0x26f   : > { %790 = vmatmul.mubr.f32.vlgmr.msra.gmra.mxu0 %v2064_v0  ;;  %861 = vmatmul.mubr.f32.vlgmr.msra.gmra.mxu1 %v2064_v0  ;;  %v610_v39 = vld [vmem:[%s1974_s21 + $0x1b8] sm:$0xff]  ;;  %v607_v40 = vld [vmem:[%s1974_s21 + $0x1a0] sm:$0xff]  ;;  %v609_v41 = vld [vmem:[%s1974_s21 + $0x1b0] sm:$0xff] }
 0x270   : > { %867 = vmatprep.subr.mxu0 %v680_v2  ;;  %938 = vmatprep.subr.mxu1 %v682_v3  ;;  %v600_v42 = vld [vmem:[%s1974_s21 + $0x168] sm:$0xff]  ;;  %v602_v43 = vld [vmem:[%s1974_s21 + $0x178] sm:$0xff]  ;;  %v599_v44 = vld [vmem:[%s1974_s21 + $0x160] sm:$0xff] }
 0x271   : > { %868 = vmatpush1.msra.mxu0 %v679_v4  ;;  %939 = vmatpush1.msra.mxu1 %v681_v5  ;;  %v601_v45 = vld [vmem:[%s1974_s21 + $0x170] sm:$0xff]  ;;  %v592_v46 = vld [vmem:[%s1974_s21 + $0x128] sm:$0xff]  ;;  %v594_v47 = vld [vmem:[%s1974_s21 + $0x138] sm:$0xff]  ;;  %v685_v4 = vlaneseq }
 0x272   : > { %869 = vmatprep.subr.mxu0 %v672_v6  ;;  %940 = vmatprep.subr.mxu1 %v674_v7  ;;  %v591_v48 = vld [vmem:[%s1974_s21 + $0x120] sm:$0xff]  ;;  %v593_v49 = vld [vmem:[%s1974_s21 + $0x130] sm:$0xff]  ;;  %v584_v50 = vld [vmem:[%s1974_s21 + $0xe8] sm:$0xff] }
 0x273   : > { %870 = vmatpush1.msra.mxu0 %v671_v8  ;;  %941 = vmatpush1.msra.mxu1 %v673_v9  ;;  %v586_v51 = vld [vmem:[%s1974_s21 + $0xf8] sm:$0xff]  ;;  %v583_v52 = vld [vmem:[%s1974_s21 + $0xe0] sm:$0xff]  ;;  %v585_v53 = vld [vmem:[%s1974_s21 + $0xf0] sm:$0xff]  ;;  %v686_v5 = vshrl.u32 %v685_v4, 7 }
 0x274   : > { %871 = vmatprep.subr.mxu0 %v664_v10  ;;  %942 = vmatprep.subr.mxu1 %v666_v11  ;;  %v576_v54 = vld [vmem:[%s1974_s21 + $0xa8] sm:$0xff]  ;;  %v578_v55 = vld [vmem:[%s1974_s21 + $0xb8] sm:$0xff]  ;;  %v575_v56 = vld [vmem:[%s1974_s21 + $0xa0] sm:$0xff] }
 0x275   : > { %872 = vmatpush1.msra.mxu0 %v663_v12  ;;  %943 = vmatpush1.msra.mxu1 %v665_v13  ;;  %v577_v57 = vld [vmem:[%s1974_s21 + $0xb0] sm:$0xff]  ;;  %v568_v58 = vld [vmem:[%s1974_s21 + $0x68] sm:$0xff]  ;;  %v570_v59 = vld [vmem:[%s1974_s21 + $0x78] sm:$0xff]  ;;  %v687_v6 = vsub.s32 0, %v686_v5  ;;  %v695_v7 = vsub.s32 2, %v686_v5  ;;  %v691_v9 = vsub.s32 1, %v686_v5 }
 0x276   : > { %873 = vmatprep.subr.mxu0 %v656_v14  ;;  %944 = vmatprep.subr.mxu1 %v658_v15  ;;  %v567_v60 = vld [vmem:[%s1974_s21 + $0x60] sm:$0xff]  ;;  %v569_v61 = vld [vmem:[%s1974_s21 + $0x70] sm:$0xff]  ;;  %v560_v62 = vld [vmem:[%s1974_s21 + $0x28] sm:$0xff]  ;;  %v699_v10 = vsub.s32 3, %v686_v5 }
 0x277   : > { %874 = vmatpush1.msra.mxu0 %v655_v16  ;;  %945 = vmatpush1.msra.mxu1 %v657_v17  ;;  %v562_v63 = vld [vmem:[%s1974_s21 + $0x38] sm:$0xff]  ;;  %v559_v2 = vld [vmem:[%s1974_s21 + $0x20] sm:$0xff]  ;;  %v561_v3 = vld [vmem:[%s1974_s21 + $0x30] sm:$0xff]  ;;  %s1193_s21 = sshll.u32 %s2281_s5, 4 }
 0x278   : > { %875 = vmatprep.subr.mxu0 %v648_v18  ;;  %946 = vmatprep.subr.mxu1 %v650_v19  ;;  %v683_v8 = vld [vmem:[%s354_s22] sm:$0xff]  ;;  %s1030_s23 = sadd.s32 %s1193_s21, %s1192_s11  ;;  %s1034_s22 = sshll.u32 %s1986_s1, 4  ;;  %s1035_s22 = int_to_ptr.vmem [resolvable:$true] %s1034_s22 }
 0x279   : > { %876 = vmatpush1.msra.mxu0 %v647_v20  ;;  %947 = vmatpush1.msra.mxu1 %v649_v21  ;;  %v688_v11 = vrot.slane %v683_v8, %v687_v6  ;;  %v696_v12 = vrot.slane %v683_v8, %v695_v7  ;;  %v692_v13 = vrot.slane %v683_v8, %v691_v9  ;;  %v703_v21 = vsub.s32 4, %v686_v5  ;;  %s1194_s16 = sshll.u32 %s1030_s23, 7  ;;  %s1523_s27 = scalar_lea.vmem %s1035_s22, 1024 }
 0x27a   : > { %877 = vmatprep.subr.mxu0 %v640_v22  ;;  %948 = vmatprep.subr.mxu1 %v642_v23  ;;  %v711_v22 = vsub.s32 6, %v686_v5  ;;  %v707_v23 = vsub.s32 5, %v686_v5  ;;  %s2152_s6 = scalar_lea.hbm %s2282_s0, %s1194_s16  ;;  %p1524_p4 = scmp.ne.s32.totalorder %s1035_s22, %s1523_s27 }
 0x27b   : > { %878 = vmatpush1.msra.mxu0 %v639_v24  ;;  %949 = vmatpush1.msra.mxu1 %v641_v25  ;;  %v715_v24 = vsub.s32 7, %v686_v5  ;;  %v704_v25 = vrot.slane %v683_v8, %v703_v21  ;;  %p1530_p10 = scmp.lt.s32.totalorder %s1035_s22, %s1528_s24  ;;  %p1531_p13 = scmp.lt.s32.totalorder %s1529_s15, %s1523_s27 }
 0x27c   : > { %879 = vmatprep.subr.mxu0 %v632_v26  ;;  %950 = vmatprep.subr.mxu1 %v634_v27  ;;  %v712_v26 = vrot.slane %v683_v8, %v711_v22  ;;  %v708_v27 = vrot.slane %v683_v8, %v707_v23  ;;  %p1525_p6 = pnand %p1524_p4, %p2283_p8 }
 0x27d   : > { %880 = vmatpush1.msra.mxu0 %v631_v28  ;;  %951 = vmatpush1.msra.mxu1 %v633_v29  ;;  %v716_v28 = vrot.slane %v683_v8, %v715_v24  ;;  %p1532_p11 = por %p1531_p13, %p1530_p10 }
 0x27e   : > { %881 = vmatprep.subr.mxu0 %v624_v30  ;;  %952 = vmatprep.subr.mxu1 %v626_v31  ;;  %p1526_p9 = pneg %p1525_p6 }
 0x27f   : > { %882 = vmatpush1.msra.mxu0 %v623_v32  ;;  %953 = vmatpush1.msra.mxu1 %v625_v33 }
 0x280   : > { %883 = vmatprep.subr.mxu0 %v616_v34  ;;  %954 = vmatprep.subr.mxu1 %v618_v35  ;;  %p1533_p7 = pnand %p1532_p11, %p1526_p9 }
 0x281   : > { %884 = vmatpush1.msra.mxu0 %v615_v36  ;;  %955 = vmatpush1.msra.mxu1 %v617_v37 }
 0x282   : > { %885 = vmatprep.subr.mxu0 %v608_v38  ;;  %956 = vmatprep.subr.mxu1 %v610_v39 }
 0x283   : > { %886 = vmatpush1.msra.mxu0 %v607_v40  ;;  %957 = vmatpush1.msra.mxu1 %v609_v41 }
 0x284   : > { %887 = vmatprep.subr.mxu0 %v600_v42  ;;  %958 = vmatprep.subr.mxu1 %v602_v43 }
 0x285   : > { %888 = vmatpush1.msra.mxu0 %v599_v44  ;;  %959 = vmatpush1.msra.mxu1 %v601_v45 }
 0x286   : > { %889 = vmatprep.subr.mxu0 %v592_v46  ;;  %960 = vmatprep.subr.mxu1 %v594_v47 }
 0x287   : > { %890 = vmatpush1.msra.mxu0 %v591_v48  ;;  %961 = vmatpush1.msra.mxu1 %v593_v49 }
 0x288   : > { %891 = vmatprep.subr.mxu0 %v584_v50  ;;  %962 = vmatprep.subr.mxu1 %v586_v51 }
 0x289   : > { %892 = vmatpush1.msra.mxu0 %v583_v52  ;;  %963 = vmatpush1.msra.mxu1 %v585_v53 }
 0x28a   : > { %893 = vmatprep.subr.mxu0 %v576_v54  ;;  %964 = vmatprep.subr.mxu1 %v578_v55 }
 0x28b   : > { %894 = vmatpush1.msra.mxu0 %v575_v56  ;;  %965 = vmatpush1.msra.mxu1 %v577_v57 }
 0x28c   : > { %895 = vmatprep.subr.mxu0 %v568_v58  ;;  %966 = vmatprep.subr.mxu1 %v570_v59 }
 0x28d   : > { %896 = vmatpush1.msra.mxu0 %v567_v60  ;;  %967 = vmatpush1.msra.mxu1 %v569_v61 }
 0x28e   : > { %897 = vmatprep.subr.mxu0 %v560_v62  ;;  %968 = vmatprep.subr.mxu1 %v562_v63 }
 0x28f   : > { %898 = vmatpush1.msra.mxu0 %v559_v2  ;;  %931 = vmatprep.mubr.f32.mxu0 %v1689_v1 }
 0x290   : > { %969 = vmatpush1.msra.mxu1 %v561_v3  ;;  %1002 = vmatprep.mubr.f32.mxu1 %v1689_v1  ;;  %v700_v1 = vrot.slane %v683_v8, %v699_v10 }
 0x291   : > { %932 = vmatmul.mubr.f32.vlgmr.msra.gmra.mxu0 %v2064_v0  ;;  %1003 = vmatmul.mubr.f32.vlgmr.msra.gmra.mxu1 %v2064_v0 }
 0x32f   : > { %v791_v14 = vpop.f32.mrf.mxu0  ;;  %v862_v0 = vpop.f32.mrf.mxu1 }
 0x330   : > { %v792_v15 = vadd.f32 %v791_v14, %v688_v11  ;;  %v863_v16 = vadd.f32 %v862_v0, %v696_v12 }
 0x331   : > { %v793_v17 = vpop.f32.mrf.mxu0  ;;  %v864_v18 = vpop.f32.mrf.mxu1 }
 0x332   : > { %1009 = vst [vmem:[%s1986_s1] sm:$0xff] %v792_v15  ;;  %1011 = vst [vmem:[%s1986_s1 + $0x10] sm:$0xff] %v863_v16  ;;  %v794_v19 = vadd.f32 %v793_v17, %v692_v13  ;;  %v865_v20 = vadd.f32 %v864_v18, %v700_v1 }
 0x334   : > { %1010 = vst [vmem:[%s1986_s1 + $0x8] sm:$0xff] %v794_v19  ;;  %1012 = vst [vmem:[%s1986_s1 + $0x18] sm:$0xff] %v865_v20 }
 0x351   : > { %v933_v29 = vpop.f32.mrf.mxu0  ;;  %v1004_v30 = vpop.f32.mrf.mxu1 }
 0x352   : > { %v934_v31 = vadd.f32 %v933_v29, %v704_v25  ;;  %v1005_v32 = vadd.f32 %v1004_v30, %v712_v26 }
 0x353   : > { %v935_v33 = vpop.f32.mrf.mxu0  ;;  %v1006_v34 = vpop.f32.mrf.mxu1 }
 0x354   : > { %1013 = vst [vmem:[%s1986_s1 + $0x20] sm:$0xff] %v934_v31  ;;  %1015 = vst [vmem:[%s1986_s1 + $0x30] sm:$0xff] %v1005_v32  ;;  %v936_v35 = vadd.f32 %v935_v33, %v708_v27  ;;  %v1007_v36 = vadd.f32 %v1006_v34, %v716_v28 }
 0x356   : > { %1014 = vst [vmem:[%s1986_s1 + $0x28] sm:$0xff] %v936_v35  ;;  %1016 = vst [vmem:[%s1986_s1 + $0x38] sm:$0xff] %v1007_v36 }
 0x357   : > { %1536 = shalt.err (!%p1533_p7)
}
 0x358   : > { %s1537_s1 = scalar_lea.hbm %s2152_s6, 1024  ;;  %s1541_s19 = scalar_lea.hbm %s2282_s0, 4096 }
 0x359   : > { %p1538_p5 = scmp.ne.s32.totalorder %s2152_s6, %s1537_s1  ;;  %p1542_p1 = scmp.lt.s32.totalorder %s2152_s6, %s2282_s0 }
 0x35a   : > { %p1543_p2 = scmp.lt.s32.totalorder %s1541_s19, %s1537_s1 }
 0x35b   : > { %p1539_p3 = pnand %p1538_p5, %p2283_p8 }
 0x35c   : > { %p1544_p12 = por %p1543_p2, %p1542_p1 }
 0x35d   : > { %p1540_p0 = pneg %p1539_p3 }
 0x35f   : > { %p1545_p4 = pnand %p1544_p12, %p1540_p0 }
 0x361   : > { %1548 = shalt.err (!%p1545_p4)
}
 0x362   : > { %1261 = dma.vmem_to_hbm [thread:$0]  (%p2283_p8), %s1035_s22, 1024, %s2152_s6, %s1018_s10  }
 0x363 PF: > { %s2284_s21 = sld [smem:[#allocation15_spill]]  ;;  %p1284_p6 = scmp.ge.s32.totalorder %s1675_s14, 2 }
 0x364   : > { %p2285_p9 = scmp.ne.s32.totalorder %s2267_s30, 0 }
 0x366   : > { %p1278_p10 = pnand %p1284_p6, %p2285_p9 }
 0x368   : > { %p1279_p13 = pneg %p1278_p10 }
 0x369   : > { %s1046_s23 = sand.u32 1, %s2284_s21  }
 0x36a   : > { %s1047_s16 = scalar_lea.sflag [#allocation5], %s1046_s23 }
 0x36b   : > { %1618 = dma.done.wait (%p1279_p13), %s1047_s16, 1024  }
 0x36c   : > { %1620 = vsyncadd (%p1279_p13), %s1047_s16, 4294966272  ;;  %s24_s14 = sadd.s32 1, %s1675_s14   ;;  %s2287_s3 = sld [smem:[#allocation21_spill]] }
 0x36d   : > { %p2179_p11 = scmp.ge.s32.totalorder %s24_s14, 6   ;;  %s2288_s11 = sld [smem:[#allocation18_spill]] }
 0x36e   : > { %s2289_s22 = sld [smem:[#allocation19_spill]]  ;;  %s2291_s24 = smov %s1627_s25 }
 0x36f   : > { %s2290_s13 = sld [smem:[#allocation20_spill]]  ;;  %s2292_s25 = smov %s1631_s26 }
 0x370   : > { %s2293_s26 = smov %s1844_s20  ;;  %s2294_s27 = smov %s1639_s28 }
 0x371   : > { %s2295_s28 = smov %s1643_s29  ;;  %s2297_s30 = smov %s1651_s8 }
 0x372   : > { %s2296_s29 = smov %s2287_s3  ;;  %s2298_s8 = smov %s1655_s9 }
 0x373   : > { %s2299_s9 = smov %s1839_s7  ;;  %s2300_s10 = smov %s1667_s12 }
 0x374   : > { %s2301_s12 = smov %s2289_s22  ;;  %23 = sbr.rel (!%p2179_p11) target bundleno = 20 (0x14), region = 123 }
 0x379   :  { %1052 = vsyncpa [#allocation4], 1 }
 0x37a   :  { %1054 = vsyncpa [#allocation4 + $0x1], 1 }
 0x37b   :  { %1055 = vsyncpa [#allocation7], 1 }
 0x37c   :  { %1056 = vsyncpa [#allocation5], 1 }
 0x37d   :  { %1058 = vsyncpa [#allocation5 + $0x1], 1 }

// kernel: tpu_custom_call.1
= control target key start
LH: loop header
LB: loop body
LE: loop exit
PB: predicated region body
PF: predicated region fallthrough
CT: control target
= control target key end

     0   :  { %s2226_s0 = inlined_call_operand.hbm [shape: f32[16,128], index: 0, kind: input, shape index: {}]   ;;  %s2227_s1 = inlined_call_operand.hbm [shape: f32[128,128], index: 1, kind: input, shape index: {}]   ;;  %s2228_s2 = inlined_call_operand.vmem [shape: f32[1,128], index: 2, kind: input, shape index: {}]   ;;  %s2229_s3 = inlined_call_operand.vmem [shape: f32[1,128], index: 3, kind: input, shape index: {}]   ;;  %s2230_s4 = inlined_call_operand.vmem [shape: f32[1,128], index: 4, kind: input, shape index: {}]   ;;  %s2231_s5 = inlined_call_operand.hbm [shape: f32[128,2048], index: 5, kind: input, shape index: {}]   ;;  %s2232_s6 = inlined_call_operand.hbm [shape: f32[1,2048], index: 6, kind: input, shape index: {}]   ;;  %s2233_s7 = inlined_call_operand.hbm [shape: f32[16,2048], index: 7, kind: output, shape index: {}]  }
   0x1   :  { %2242 = sst [smem:[#allocation22_spill]] %s2226_s0 }
   0x2   :  { %2243 = sst [smem:[#allocation23_spill]] %s2227_s1 }
   0x3   :  { %2244 = sst [smem:[#allocation24_spill]] %s2228_s2 }
   0x4   :  { %2245 = sst [smem:[#allocation25_spill]] %s2229_s3 }
   0x5   :  { %2246 = sst [smem:[#allocation26_spill]] %s2230_s4 }
   0x6   :  { %2247 = sst [smem:[#allocation27_spill]] %s2231_s5 }
   0x7   :  { %2248 = sst [smem:[#allocation28_spill]] %s2232_s6 }
   0x8   :  { %2249 = sst [smem:[#allocation29_spill]] %s2233_s7 }
   0x9   :  { %12 = vsyncpa [#allocation4], 0 }
   0xa   :  { %14 = vsyncpa [#allocation4 + $0x1], 0 }
   0xb   :  { %15 = vsyncpa [#allocation7], 0 }
   0xc   :  { %16 = vsyncpa [#allocation5], 0 }
   0xd   :  { %18 = vsyncpa [#allocation5 + $0x1], 0  ;;  %s1731_s24 = smov 0   ;;  %s1733_s25 = smov 0  }
   0xe   :  { %s1735_s26 = smov 0   ;;  %s1737_s27 = smov 0  }
   0xf   :  { %s1739_s28 = smov 0   ;;  %s1741_s29 = smov 0  }
  0x10   :  { %s1743_s30 = smov 0   ;;  %s1745_s8 = smov 0  }
  0x11   :  { %s1747_s9 = smov 0   ;;  %s1749_s10 = smov 0  }
  0x12   :  { %s1751_s11 = smov 0   ;;  %s1753_s12 = smov 0  }
  0x13   :  { %s1755_s13 = smov 0   ;;  %s1757_s14 = smov 0  }
  0x14 LB: > { %2250 = sst [smem:[#allocation15_spill]] %s1623_s24  ;;  %s33_s15 = sadd.s32 1, %s1667_s12  ;;  %s1675_s14 = sphi %s1757_s14, %s24_s14   ;;  %s1671_s13 = sphi %s1755_s13, %s2290_s13   ;;  %s1667_s12 = sphi %s1753_s12, %s2301_s12   ;;  %s1663_s11 = sphi %s1751_s11, %s2288_s11   ;;  %s1659_s10 = sphi %s1749_s10, %s2300_s10   ;;  %s1655_s9 = sphi %s1747_s9, %s2299_s9   ;;  %s1651_s8 = sphi %s1745_s8, %s2298_s8   ;;  %s1647_s30 = sphi %s1743_s30, %s2297_s30   ;;  %s1643_s29 = sphi %s1741_s29, %s2296_s29   ;;  %s1639_s28 = sphi %s1739_s28, %s2295_s28   ;;  %s1635_s27 = sphi %s1737_s27, %s2294_s27   ;;  %s1631_s26 = sphi %s1735_s26, %s2293_s26   ;;  %s1627_s25 = sphi %s1733_s25, %s2292_s25   ;;  %s1623_s24 = sphi %s1731_s24, %s2291_s24  }
  0x15   : > { %2251 = sst [smem:[#allocation16_spill]] %s1659_s10  ;;  %s36_s16 = sadd.s32 1, %s1671_s13 }
  0x16   : > { %2252 = sst [smem:[#allocation17_spill]] %s1663_s11  ;;  %p34_p0 = scmp.ge.s32.totalorder %s33_s15, 2 }
  0x17   : > { %2253 = sst [smem:[#allocation18_spill]] %s1671_s13  ;;  %s43_s17 = sadd.s32 1, %s1655_s9 }
  0x18   : > { %p50_p1 = scmp.ne.s32.totalorder %s1655_s9, %s1651_s8  ;;  %p51_p2 = scmp.eq.s32.totalorder %s1675_s14, 0 }
  0x19   : > { %s2303_s15 = smov (%p34_p0, %s33_s15), 0  ;;  %s2305_s16 = smov (!%p34_p0, %s36_s16), %s1671_s13 }
  0x1a   : > { %2254 = sst [smem:[#allocation19_spill]] %s2303_s15  ;;  %p1812_p3 = por %p51_p2, %p50_p1 }
  0x1b   : > { %p56_p4 = scmp.ne.s32.totalorder %s1651_s8, %s1647_s30  ;;  %p38_p5 = scmp.ge.s32.totalorder %s2305_s16, 2 }
  0x1c   : > { %s150_s19 = ssub.s32 %s1667_s12, %s2303_s15  ;;  %s153_s20 = sadd.s32 1, %s1643_s29 }
  0x1d   : > { %p151_p6 = scmp.eq.s32.totalorder %s150_s19, 0  ;;  %s2307_s16 = smov (%p38_p5, %s2305_s16), 0 }
  0x1e   : > { %2256 = sst [smem:[#allocation20_spill]] %s2307_s16  ;;  %s40_s22 = ssub.s32 %s1671_s13, %s2307_s16 }
  0x1f   : > { %s1824_s21 = scalar_select %p151_p6, %s1643_s29, %s153_s20  }
  0x20   : > { %p160_p7 = scmp.ne.s32.totalorder %s1643_s29, %s1639_s28  ;;  %p41_p8 = scmp.eq.s32.totalorder %s40_s22, 0 }
  0x21   : > { %2257 = sst [smem:[#allocation21_spill]] %s1824_s21  ;;  %p166_p9 = scmp.ne.s32.totalorder %s1639_s28, %s1635_s27 }
  0x22   : > { %p1834_p10 = por %p160_p7, %p51_p2  ;;  %s204_s15 = sor.u32 %s150_s19, %s40_s22 }
  0x23   : > { %s1839_s7 = scalar_select %p41_p8, %s1655_s9, %s43_s17  }
  0x24   : > { %p205_p11 = scmp.eq.s32.totalorder %s204_s15, 0  ;;  %s207_s11 = sadd.s32 1, %s1631_s26 }
  0x25   : > { %p1282_p12 = scmp.lt.s32.totalorder %s1675_s14, 4  ;;  %s266_s16 = sand.u32 1, %s1675_s14  }
  0x26   : > { %s1844_s20 = scalar_select %p205_p11, %s1631_s26, %s207_s11  }
  0x27   : > { %s268_s21 = sand.u32 1, %s1655_s9   ;;  %s1174_s3 = sshll.u32 %s1671_s13, 7 }
  0x28   : > { %s1173_s4 = sshll.u32 %s268_s21, 3  ;;  %s2259_s0 = sld [smem:[#allocation22_spill]] }
  0x29   : > { %s270_s6 = scalar_lea.vmem [#allocation3], %s1173_s4  ;;  %p1854_p13 = pnand %p1282_p12, %p1812_p3 }
  0x2a   : > { %s277_s24 = sshll.u32 %s270_s6, 4  ;;  %p1860_p0 = pnand %p1282_p12, %p1834_p10  ;;  %s278_s24 = int_to_ptr.vmem [resolvable:$true] %s277_s24 }
  0x2b   : > { %s286_s15 = sand.u32 1, %s1643_s29   ;;  %s1867_s21 = scalar_lea.sflag [#allocation4], %s266_s16 }
  0x2c   : > { %s1175_s19 = sshll.u32 %s286_s15, 10  ;;  %p1415_p1 = pneg %p1854_p13 }
  0x2d   : > { %s1426_s2 = scalar_lea.vmem %s278_s24, 128 }
  0x2e   : > { %s275_s1 = scalar_lea.hbm %s2259_s0, %s1174_s3  ;;  %p1427_p2 = scmp.ne.s32.totalorder %s278_s24, %s1426_s2 }
  0x2f   : > { %s1677_s3 = smov [#allocation3]  }
  0x30   : > { %p1429_p5 = pnand %p1427_p2, %p1415_p1  ;;  %s1431_s4 = sshll.u32 %s1677_s3, 4  ;;  %s1432_s4 = int_to_ptr.vmem [resolvable:$false] %s1431_s4 }
  0x31   : > { %s1433_s6 = scalar_lea.vmem %s1432_s4, 256  ;;  %p1434_p6 = scmp.lt.s32.totalorder %s278_s24, %s1432_s4 }
  0x32   : > { %p1430_p3 = pneg %p1429_p5  ;;  %p1435_p7 = scmp.lt.s32.totalorder %s1433_s6, %s1426_s2 }
  0x34   : > { %p1436_p8 = por %p1435_p7, %p1434_p6 }
  0x36   : > { %p1437_p10 = pnand %p1436_p8, %p1430_p3 }
  0x38   : > { %1440 = shalt.err (!%p1437_p10)
}
  0x39   : > { %1270 = dma.hbm_to_vmem [thread:$0]  (!%p1854_p13), %s275_s1, 128, %s278_s24, %s1867_s21  }
  0x3a   : > { %s1197_s10 = sshll.u32 %s1667_s12, 10  ;;  %s288_s16 = scalar_lea.vmem [#allocation8], %s1175_s19 }
  0x3b   : > { %s295_s18 = sshll.u32 %s288_s16, 4  ;;  %s2262_s5 = sld [smem:[#allocation27_spill]]  ;;  %s296_s18 = int_to_ptr.vmem [resolvable:$true] %s295_s18 }
  0x3c   : > { %p2237_p11 = pneg %p1860_p0  ;;  %s1454_s2 = scalar_lea.vmem %s296_s18, 16384 }
  0x3d   : > { %p1455_p12 = scmp.ne.s32.totalorder %s296_s18, %s1454_s2  ;;  %s1678_s17 = smov [#allocation8]  }
  0x3e   : > { %s1459_s4 = sshll.u32 %s1678_s17, 4  ;;  %s1460_s4 = int_to_ptr.vmem [resolvable:$false] %s1459_s4 }
  0x3f   : > { %p1457_p1 = pnand %p1455_p12, %p2237_p11  ;;  %s1461_s1 = scalar_lea.vmem %s1460_s4, 32768 }
  0x40   : > { %p1462_p13 = scmp.lt.s32.totalorder %s296_s18, %s1460_s4  ;;  %p1463_p5 = scmp.lt.s32.totalorder %s1461_s1, %s1454_s2 }
  0x41   : > { %s294_s3 = scalar_lea.hbm %s2262_s5, %s1197_s10  ;;  %p1458_p2 = pneg %p1457_p1 }
  0x42   : > { %p1464_p3 = por %p1463_p5, %p1462_p13 }
  0x44   : > { %p1465_p6 = pnand %p1464_p3, %p1458_p2 }
  0x46   : > { %1468 = shalt.err (!%p1465_p6)
}
  0x47   : > { %s1679_s24 = smov 2048   ;;  %s2263_s19 = sld [smem:[#allocation15_spill]] }
  0x48   : > { %s1680_s6 = smov 1024   ;;  %s1681_s10 = smov 64  }
  0x49   : > { %1273 = dma.hbm_to_vmem [thread:$0]  (!%p1860_p0), %s294_s3, 16384, %s296_s18, %s1867_s21, %s1679_s24, %s1680_s6, %s1681_s10  }
  0x4a   : > { %s1887_s16 = sadd.s32 4294967295, %s1675_s14   ;;  %s1169_s22 = sadd.s32 4294967294, %s1675_s14  }
  0x4b   : > { %p2238_p7 = scmp.eq.s32.totalorder %s1887_s16, 0  ;;  %p217_p8 = scmp.ne.s32.totalorder %s1631_s26, %s1627_s25 }
  0x4c   : > { %p218_p10 = scmp.eq.s32.totalorder %s1887_s16, 3  ;;  %p224_p5 = scmp.eq.s32.totalorder %s1169_s22, 3 }
  0x4d   : > { %p1899_p12 = por %p2238_p7, %p56_p4  ;;  %p1908_p1 = por %p166_p9, %p2238_p7 }
  0x4e   : > { %p1912_p2 = por %p218_p10, %p217_p8  ;;  %p223_p13 = scmp.ne.s32.totalorder %s1627_s25, %s2263_s19 }
  0x4f   : > { %s2265_s18 = scalar_select %p1908_p1, 1, 0 }
  0x50   : > { %s2266_s3 = scalar_select %p1912_p2, 1, 0 }
  0x51   : > { %p1170_p3 = scmp.ge.s32.totalorder %s1675_s14, 1  ;;  %p231_p6 = scmp.lt.s32.totalorder %s1675_s14, 5 }
  0x52   : > { %p1920_p11 = por %p224_p5, %p223_p13  ;;  %s1682_s27 = smov [#allocation6]  }
  0x53   : > { %p1924_p4 = pnand %p1170_p3, %p231_p6  ;;  %s243_s17 = sshll.u32 %s1682_s27, 4  ;;  %s244_s17 = int_to_ptr.vmem [resolvable:$true] %s243_s17 }
  0x54   : > { %s2267_s30 = scalar_select %p1920_p11, 1, 0 }
  0x55   : > { %p1263_p9 = pneg %p1924_p4  ;;  %s1178_s4 = sshll.u32 %s286_s15, 3 }
  0x56   : > { %s1198_s1 = sshll.u32 %s1667_s12, 7  ;;  %s2270_s10 = sld [smem:[#allocation28_spill]] }
  0x57   : > { %p1935_p8 = pnand %p1263_p9, %p2238_p7  ;;  %s309_s0 = scalar_lea.vmem [#allocation9], %s1178_s4 }
  0x58   : > { %s317_s5 = sshll.u32 %s309_s0, 4  ;;  %s1480_s27 = scalar_lea.vmem %s244_s17, 2048  ;;  %s318_s5 = int_to_ptr.vmem [resolvable:$true] %s317_s5 }
  0x59   : > { %p1471_p10 = pneg %p1935_p8  ;;  %p1481_p13 = scmp.ne.s32.totalorder %s244_s17, %s1480_s27 }
  0x5a   : > { %p1488_p6 = scmp.lt.s32.totalorder %s244_s17, %s244_s17  ;;  %p1489_p9 = scmp.lt.s32.totalorder %s1480_s27, %s1480_s27 }
  0x5b   : > { %p1483_p5 = pnand %p1481_p13, %p1471_p10 }
  0x5c   : > { %s1942_s22 = scalar_lea.hbm %s2270_s10, %s1198_s1  ;;  %p1490_p7 = por %p1489_p9, %p1488_p6 }
  0x5d   : > { %p1484_p3 = pneg %p1483_p5 }
  0x5f   : > { %p1491_p11 = pnand %p1490_p7, %p1484_p3 }
  0x61   : > { %1494 = shalt.err (!%p1491_p11)
}
  0x62   : > { %s1683_s15 = smov 128   ;;  %s1684_s19 = smov 8  }
  0x63   : > { %s2271_s0 = sld [smem:[#allocation23_spill]]  ;;  %s1508_s6 = scalar_lea.vmem %s318_s5, 128 }
  0x64   : > { %p1509_p2 = scmp.ne.s32.totalorder %s318_s5, %s1508_s6  ;;  %p2272_p1 = pneg %p1860_p0 }
  0x65   : > { %s1685_s10 = smov [#allocation9]  }
  0x66   : > { %p1511_p10 = pnand %p1509_p2, %p2272_p1  ;;  %s1513_s27 = sshll.u32 %s1685_s10, 4  ;;  %s1514_s27 = int_to_ptr.vmem [resolvable:$false] %s1513_s27 }
  0x67   : > { %s1515_s13 = scalar_lea.vmem %s1514_s27, 256  ;;  %p1516_p11 = scmp.lt.s32.totalorder %s318_s5, %s1514_s27 }
  0x68   : > { %p1512_p13 = pneg %p1511_p10  ;;  %p1517_p7 = scmp.lt.s32.totalorder %s1515_s13, %s1508_s6 }
  0x69   : > { %1266 = dma.hbm_to_vmem [thread:$0]  (!%p1935_p8), %s2271_s0, 2048, %s244_s17, [#allocation7], %s1683_s15, %s1683_s15, %s1684_s19  }
  0x6a   : > { %p1518_p5 = por %p1517_p7, %p1516_p11 }
  0x6c   : > { %p1519_p3 = pnand %p1518_p5, %p1512_p13 }
  0x6e   : > { %1522 = shalt.err (!%p1519_p3)
}
  0x6f   : > { %1276 = dma.hbm_to_vmem [thread:$0]  (!%p1860_p0), %s1942_s22, 128, %s318_s5, %s1867_s21  }
  0x70   : > { %326 = sbr.rel (%p1924_p4) target bundleno = 867 (0x363), region = 48  ;;  %s328_s17 = sand.u32 (!%p1924_p4), 1, %s1887_s16  }
  0x71   : > { %s330_s24 = sand.u32 (!%p1924_p4), 1, %s1651_s8   ;;  %s329_s13 = scalar_lea.sflag (!%p1924_p4), [#allocation4], %s328_s17 }
  0x72   : > { %s1962_s15 = sshll.u32 (!%p1924_p4), %s330_s24, 3 }
  0x73   : > { %s332_s19 = scalar_lea.vmem (!%p1924_p4), [#allocation3], %s1962_s15 }
  0x75   : > { %1606 = dma.done.wait (%p1899_p12), %s329_s13, 128  }
  0x76   : > { %1608 = vsyncadd (%p1899_p12), %s329_s13, 4294967168  ;;  %p2273_p0 = scmp.eq.s32.totalorder %s1887_s16, 0 }
  0x78   : > { %1610 = dma.done.wait (%p2273_p0), [#allocation7], 2048   ;;  %p2274_p1 = pmov %p2273_p0 }
  0x79   : > { %s343_s5 = sand.u32 1, %s1639_s28   ;;  %p2275_p2 = scmp.ne.s32.totalorder %s2265_s18, 0 }
  0x7a   : > { %1612 = vsyncadd (%p2274_p1), [#allocation7], 4294965248  ;;  %s1184_s11 = sshll.u32 %s343_s5, 10 }
  0x7b   : > { %s1974_s21 = scalar_lea.vmem [#allocation8], %s1184_s11 }
  0x7c   : > { %1614 = dma.done.wait (%p2275_p2), %s329_s13, 16512  }
  0x7d   : > { %1616 = vsyncadd (%p2275_p2), %s329_s13, 4294950784  ;;  %s1980_s23 = sshll.u32 %s343_s5, 3  ;;  %s392_s2 = sand.u32 1, %s1627_s25  }
  0x7e   : > { %s1186_s16 = sshll.u32 %s392_s2, 6  ;;  %s354_s22 = scalar_lea.vmem [#allocation9], %s1980_s23 }
  0x7f   : > { %s1986_s1 = scalar_lea.vmem [#allocation10], %s1186_s16  ;;  %s2276_s4 = sld [smem:[#allocation16_spill]] }
  0x85   : > { %p1187_p12 = scmp.ne.s32.totalorder %s2276_s4, 0 }
  0x86   : > { %s2277_s6 = sld [smem:[#allocation24_spill]] (!%p1187_p12) }
  0x87   : > { %401 = sbr.rel (%p1187_p12) target bundleno = 589 (0x24d), region = 68  ;;  %s2278_s17 = sld [smem:[#allocation25_spill]] (!%p1187_p12) }
  0x88   : > { %s2279_s13 = sld [smem:[#allocation26_spill]] (!%p1187_p12) }
  0x8c   : > { %v418_v0 = vld [vmem:[#allocation6 + $0x78] sm:$0xff]  ;;  %v1686_v1 = vmov 0.0   ;;  %v417_v2 = vld [vmem:[#allocation6 + $0x70] sm:$0xff]  ;;  %vm1687_vm0 = vmmov 0   ;;  %v416_v3 = vld [vmem:[#allocation6 + $0x68] sm:$0xff]  ;;  %v1688_v42 = vmov -1.0  }
  0x8d   : > { %1216 = vmatprep.subr.mxu0 %v1686_v1  ;;  %1248 = vmatprep.mubr.msk.f32.mxu0 %vm1687_vm0, %v1686_v1  ;;  %v415_v4 = vld [vmem:[#allocation6 + $0x60] sm:$0xff]  ;;  %v414_v5 = vld [vmem:[#allocation6 + $0x58] sm:$0xff]  ;;  %v413_v6 = vld [vmem:[#allocation6 + $0x50] sm:$0xff] }
  0x8e   : > { %1217 = vmatpush3.msra.mxu0 %v418_v0  ;;  %v412_v7 = vld [vmem:[#allocation6 + $0x48] sm:$0xff]  ;;  %v411_v8 = vld [vmem:[#allocation6 + $0x40] sm:$0xff]  ;;  %v410_v9 = vld [vmem:[#allocation6 + $0x38] sm:$0xff] }
  0x8f   : > { %1218 = vmatprep.subr.mxu0 %v1686_v1  ;;  %v409_v10 = vld [vmem:[#allocation6 + $0x30] sm:$0xff]  ;;  %v408_v11 = vld [vmem:[#allocation6 + $0x28] sm:$0xff]  ;;  %v407_v12 = vld [vmem:[#allocation6 + $0x20] sm:$0xff] }
  0x90   : > { %1219 = vmatpush3.msra.mxu0 %v417_v2  ;;  %v406_v13 = vld [vmem:[#allocation6 + $0x18] sm:$0xff]  ;;  %v405_v14 = vld [vmem:[#allocation6 + $0x10] sm:$0xff]  ;;  %v404_v15 = vld [vmem:[#allocation6 + $0x8] sm:$0xff] }
  0x91   : > { %1220 = vmatprep.subr.mxu0 %v1686_v1  ;;  %v403_v16 = vld [vmem:[#allocation6] sm:$0xff]  ;;  %v402_v17 = vld [vmem:[%s332_s19] sm:$0xff]  ;;  %v1188_v18 = vld [vmem:[%s2277_s6] ss:$0 sm:$0xff] }
  0x92   : > { %1221 = vmatpush3.msra.mxu0 %v416_v3  ;;  %v1189_v59 = vld [vmem:[%s2278_s17] ss:$0 sm:$0xff] }
  0x93   : > { %1222 = vmatprep.subr.mxu0 %v1686_v1  ;;  %v1190_v61 = vld [vmem:[%s2279_s13] ss:$0 sm:$0xff] }
  0x94   : > { %1223 = vmatpush3.msra.mxu0 %v415_v4 }
  0x95   : > { %1224 = vmatprep.subr.mxu0 %v1686_v1 }
  0x96   : > { %1225 = vmatpush3.msra.mxu0 %v414_v5 }
  0x97   : > { %1226 = vmatprep.subr.mxu0 %v1686_v1 }
  0x98   : > { %1227 = vmatpush3.msra.mxu0 %v413_v6 }
  0x99   : > { %1228 = vmatprep.subr.mxu0 %v1686_v1 }
  0x9a   : > { %1229 = vmatpush3.msra.mxu0 %v412_v7 }
  0x9b   : > { %1230 = vmatprep.subr.mxu0 %v1686_v1 }
  0x9c   : > { %1231 = vmatpush3.msra.mxu0 %v411_v8 }
  0x9d   : > { %1232 = vmatprep.subr.mxu0 %v1686_v1 }
  0x9e   : > { %1233 = vmatpush3.msra.mxu0 %v410_v9 }
  0x9f   : > { %1234 = vmatprep.subr.mxu0 %v1686_v1 }
  0xa0   : > { %1235 = vmatpush3.msra.mxu0 %v409_v10 }
  0xa1   : > { %1236 = vmatprep.subr.mxu0 %v1686_v1 }
  0xa2   : > { %1237 = vmatpush3.msra.mxu0 %v408_v11 }
  0xa3   : > { %1238 = vmatprep.subr.mxu0 %v1686_v1 }
  0xa4   : > { %1239 = vmatpush3.msra.mxu0 %v407_v12 }
  0xa5   : > { %1240 = vmatprep.subr.mxu0 %v1686_v1 }
  0xa6   : > { %1241 = vmatpush3.msra.mxu0 %v406_v13 }
  0xa7   : > { %1242 = vmatprep.subr.mxu0 %v1686_v1 }
  0xa8   : > { %1243 = vmatpush3.msra.mxu0 %v405_v14 }
  0xa9   : > { %1244 = vmatprep.subr.mxu0 %v1686_v1 }
  0xaa   : > { %1245 = vmatpush3.msra.mxu0 %v404_v15 }
  0xab   : > { %1246 = vmatprep.subr.mxu0 %v1686_v1 }
  0xac   : > { %1247 = vmatpush3.msra.mxu0 %v403_v16 }
  0xad   : > { %1249 = vmatmul.mubr.f32.vlgmr.msra.gmra.mxu0 %v402_v17 }
 0x16d   : > { %v492_v19 = vpop.f32.mrf.mxu0 }
 0x16e   : > { %v493_v20 = vadd.f32 %v1188_v18, %v492_v19 }
 0x16f   : > { %v1250_v21 = vpop.f32.mrf.mxu0 }
 0x170   : > { %v497_v22 = vmul.f32 0.70710677, %v493_v20  ;;  %v496_v45 = vmul.f32 0.5, %v493_v20 }
 0x172   : > { %v500_v23 = vand.u32 2147483647, %v497_v22  ;;  %vm498_vm1 = vcmp.ge.f32.partialorder %v497_v22, 0.0 }
 0x173   : > { %v499_v43 = vsel %vm498_vm1, 1.0, %v1688_v42 }
 0x174   : > { %v501_v24 = vmul.f32 0.3275911, %v500_v23  ;;  %v514_v26 = vsub.f32 0.0, %v500_v23 }
 0x176   : > { %v502_v25 = vadd.f32 1.0, %v501_v24  ;;  %v515_v27 = vmul.f32 %v514_v26, %v500_v23 }
 0x178   : > { %1407 = vrcp.f32 %v502_v25  ;;  %v516_v29 = vmul.f32 1.442695, %v515_v27 }
 0x17a   : > { %1409 = vpow2.f32 %v516_v29 }
 0x185   : > { %v1408_v28 = vpop.eup %1407 }
 0x186   : > { %v505_v30 = vmul.f32 1.0614054, %v1408_v28 }
 0x187   : > { %v1410_v39 = vpop.eup %1409 }
 0x188   : > { %v506_v31 = vadd.f32 -1.4531521, %v505_v30 }
 0x18a   : > { %v507_v32 = vmul.f32 %v1408_v28, %v506_v31 }
 0x18c   : > { %v508_v33 = vadd.f32 1.4214138, %v507_v32 }
 0x18e   : > { %v509_v34 = vmul.f32 %v1408_v28, %v508_v33 }
 0x190   : > { %v510_v35 = vadd.f32 -0.28449672, %v509_v34 }
 0x192   : > { %v511_v36 = vmul.f32 %v1408_v28, %v510_v35 }
 0x194   : > { %v512_v37 = vadd.f32 0.2548296, %v511_v36 }
 0x196   : > { %v513_v38 = vmul.f32 %v1408_v28, %v512_v37 }
 0x198   : > { %v518_v40 = vmul.f32 %v1410_v39, %v513_v38 }
 0x19a   : > { %v519_v41 = vsub.f32 1.0, %v518_v40 }
 0x19c   : > { %v520_v44 = vmul.f32 %v519_v41, %v499_v43 }
 0x19e   : > { %v521_v46 = vadd.f32 1.0, %v520_v44 }
 0x1a0   : > { %v522_v47 = vmul.f32 %v521_v46, %v496_v45 }
 0x1a2   : > { %523 = vadd.xlane.f32.xlu0 %v522_v47  ;;  %v526_v48 = vmul.f32 %v522_v47, %v522_v47 }
 0x1a6   : > { %527 = vadd.xlane.f32.xlu0 %v526_v48 }
 0x22b   : > { %v524_v49 = vpop.xlane.xlu0 %523 }
 0x22c   : > { %v525_v50 = vmul.f32 0.0078125, %v524_v49 }
 0x22e   : > { %v530_v52 = vmul.f32 %v525_v50, %v525_v50  ;;  %v533_v57 = vsub.f32 %v522_v47, %v525_v50 }
 0x22f   : > { %v528_v51 = vpop.xlane.xlu0 %527 }
 0x230   : > { %v529_v53 = vmul.f32 0.0078125, %v528_v51 }
 0x232   : > { %v531_v54 = vsub.f32 %v529_v53, %v530_v52 }
 0x234   : > { %v532_v55 = vmax.f32 %v531_v54, 0.0 }
 0x236   : > { %v534_v56 = vadd.f32 1e-12, %v532_v55 }
 0x238   : > { %1411 = vrsqrt.f32 %v534_v56 }
 0x245   : > { %v1412_v58 = vpop.eup %1411 }
 0x246   : > { %v536_v60 = vmul.f32 %v1412_v58, %v533_v57 }
 0x248   : > { %v544_v62 = vmul.f32 %v1189_v59, %v536_v60 }
 0x24a   : > { %v552_v63 = vadd.f32 %v1190_v61, %v544_v62 }
 0x24c   : > { %553 = vst [vmem:[#allocation2] sm:$0xff] %v552_v63 }
 0x24d PF: > { %v676_v0 = vld [vmem:[%s1974_s21 + $0x3c8] sm:$0xff]  ;;  %v678_v1 = vld [vmem:[%s1974_s21 + $0x3d8] sm:$0xff]  ;;  %v675_v2 = vld [vmem:[%s1974_s21 + $0x3c0] sm:$0xff]  ;;  %s2280_s19 = sld [smem:[#allocation16_spill]]  ;;  %s1018_s10 = scalar_lea.sflag [#allocation5], %s392_s2 }
 0x24e   : > { %725 = vmatprep.subr.mxu0 %v676_v0  ;;  %796 = vmatprep.subr.mxu1 %v678_v1  ;;  %v677_v3 = vld [vmem:[%s1974_s21 + $0x3d0] sm:$0xff]  ;;  %v668_v4 = vld [vmem:[%s1974_s21 + $0x388] sm:$0xff]  ;;  %v670_v5 = vld [vmem:[%s1974_s21 + $0x398] sm:$0xff]  ;;  %v1689_v1 = vmov 0.0   ;;  %s2281_s5 = sld [smem:[#allocation17_spill]]  ;;  %p2283_p8 = scmp.ne.s32.totalorder %s2266_s3, 0 }
 0x24f   : > { %726 = vmatpush1.msra.mxu0 %v675_v2  ;;  %797 = vmatpush1.msra.mxu1 %v677_v3  ;;  %v667_v6 = vld [vmem:[%s1974_s21 + $0x380] sm:$0xff]  ;;  %v669_v7 = vld [vmem:[%s1974_s21 + $0x390] sm:$0xff]  ;;  %v660_v8 = vld [vmem:[%s1974_s21 + $0x348] sm:$0xff]  ;;  %s2282_s0 = sld [smem:[#allocation29_spill]]  ;;  %s1690_s17 = smov [#allocation10]  }
 0x250   : > { %727 = vmatprep.subr.mxu0 %v668_v4  ;;  %798 = vmatprep.subr.mxu1 %v670_v5  ;;  %v662_v9 = vld [vmem:[%s1974_s21 + $0x358] sm:$0xff]  ;;  %v659_v10 = vld [vmem:[%s1974_s21 + $0x340] sm:$0xff]  ;;  %v661_v11 = vld [vmem:[%s1974_s21 + $0x350] sm:$0xff]  ;;  %s1527_s24 = sshll.u32 %s1690_s17, 4  ;;  %s1528_s24 = int_to_ptr.vmem [resolvable:$false] %s1527_s24 }
 0x251   : > { %728 = vmatpush1.msra.mxu0 %v667_v6  ;;  %799 = vmatpush1.msra.mxu1 %v669_v7  ;;  %v652_v12 = vld [vmem:[%s1974_s21 + $0x308] sm:$0xff]  ;;  %v654_v13 = vld [vmem:[%s1974_s21 + $0x318] sm:$0xff]  ;;  %v651_v14 = vld [vmem:[%s1974_s21 + $0x300] sm:$0xff]  ;;  %s1529_s15 = scalar_lea.vmem %s1528_s24, 2048 }
 0x252   : > { %729 = vmatprep.subr.mxu0 %v660_v8  ;;  %800 = vmatprep.subr.mxu1 %v662_v9  ;;  %v653_v15 = vld [vmem:[%s1974_s21 + $0x310] sm:$0xff]  ;;  %v644_v16 = vld [vmem:[%s1974_s21 + $0x2c8] sm:$0xff]  ;;  %v646_v17 = vld [vmem:[%s1974_s21 + $0x2d8] sm:$0xff] }
 0x253   : > { %730 = vmatpush1.msra.mxu0 %v659_v10  ;;  %801 = vmatpush1.msra.mxu1 %v661_v11  ;;  %v643_v18 = vld [vmem:[%s1974_s21 + $0x2c0] sm:$0xff]  ;;  %v645_v19 = vld [vmem:[%s1974_s21 + $0x2d0] sm:$0xff]  ;;  %v636_v20 = vld [vmem:[%s1974_s21 + $0x288] sm:$0xff]  ;;  %s1192_s11 = sshll.u32 %s2280_s19, 3 }
 0x254   : > { %731 = vmatprep.subr.mxu0 %v652_v12  ;;  %802 = vmatprep.subr.mxu1 %v654_v13  ;;  %v638_v21 = vld [vmem:[%s1974_s21 + $0x298] sm:$0xff]  ;;  %v635_v22 = vld [vmem:[%s1974_s21 + $0x280] sm:$0xff]  ;;  %v637_v23 = vld [vmem:[%s1974_s21 + $0x290] sm:$0xff] }
 0x255   : > { %732 = vmatpush1.msra.mxu0 %v651_v14  ;;  %803 = vmatpush1.msra.mxu1 %v653_v15  ;;  %v628_v24 = vld [vmem:[%s1974_s21 + $0x248] sm:$0xff]  ;;  %v630_v25 = vld [vmem:[%s1974_s21 + $0x258] sm:$0xff]  ;;  %v627_v26 = vld [vmem:[%s1974_s21 + $0x240] sm:$0xff] }
 0x256   : > { %733 = vmatprep.subr.mxu0 %v644_v16  ;;  %804 = vmatprep.subr.mxu1 %v646_v17  ;;  %v629_v27 = vld [vmem:[%s1974_s21 + $0x250] sm:$0xff]  ;;  %v620_v28 = vld [vmem:[%s1974_s21 + $0x208] sm:$0xff]  ;;  %v622_v29 = vld [vmem:[%s1974_s21 + $0x218] sm:$0xff] }
 0x257   : > { %734 = vmatpush1.msra.mxu0 %v643_v18  ;;  %805 = vmatpush1.msra.mxu1 %v645_v19  ;;  %v619_v30 = vld [vmem:[%s1974_s21 + $0x200] sm:$0xff]  ;;  %v621_v31 = vld [vmem:[%s1974_s21 + $0x210] sm:$0xff]  ;;  %v612_v32 = vld [vmem:[%s1974_s21 + $0x1c8] sm:$0xff] }
 0x258   : > { %735 = vmatprep.subr.mxu0 %v636_v20  ;;  %806 = vmatprep.subr.mxu1 %v638_v21  ;;  %v614_v33 = vld [vmem:[%s1974_s21 + $0x1d8] sm:$0xff]  ;;  %v611_v34 = vld [vmem:[%s1974_s21 + $0x1c0] sm:$0xff]  ;;  %v613_v35 = vld [vmem:[%s1974_s21 + $0x1d0] sm:$0xff] }
 0x259   : > { %736 = vmatpush1.msra.mxu0 %v635_v22  ;;  %807 = vmatpush1.msra.mxu1 %v637_v23  ;;  %v604_v36 = vld [vmem:[%s1974_s21 + $0x188] sm:$0xff]  ;;  %v606_v37 = vld [vmem:[%s1974_s21 + $0x198] sm:$0xff]  ;;  %v603_v38 = vld [vmem:[%s1974_s21 + $0x180] sm:$0xff] }
 0x25a   : > { %737 = vmatprep.subr.mxu0 %v628_v24  ;;  %808 = vmatprep.subr.mxu1 %v630_v25  ;;  %v605_v39 = vld [vmem:[%s1974_s21 + $0x190] sm:$0xff]  ;;  %v596_v40 = vld [vmem:[%s1974_s21 + $0x148] sm:$0xff]  ;;  %v598_v41 = vld [vmem:[%s1974_s21 + $0x158] sm:$0xff] }
 0x25b   : > { %738 = vmatpush1.msra.mxu0 %v627_v26  ;;  %809 = vmatpush1.msra.mxu1 %v629_v27  ;;  %v595_v42 = vld [vmem:[%s1974_s21 + $0x140] sm:$0xff]  ;;  %v597_v43 = vld [vmem:[%s1974_s21 + $0x150] sm:$0xff]  ;;  %v588_v44 = vld [vmem:[%s1974_s21 + $0x108] sm:$0xff] }
 0x25c   : > { %739 = vmatprep.subr.mxu0 %v620_v28  ;;  %810 = vmatprep.subr.mxu1 %v622_v29  ;;  %v590_v45 = vld [vmem:[%s1974_s21 + $0x118] sm:$0xff]  ;;  %v587_v46 = vld [vmem:[%s1974_s21 + $0x100] sm:$0xff]  ;;  %v589_v47 = vld [vmem:[%s1974_s21 + $0x110] sm:$0xff] }
 0x25d   : > { %740 = vmatpush1.msra.mxu0 %v619_v30  ;;  %811 = vmatpush1.msra.mxu1 %v621_v31  ;;  %v580_v48 = vld [vmem:[%s1974_s21 + $0xc8] sm:$0xff]  ;;  %v582_v49 = vld [vmem:[%s1974_s21 + $0xd8] sm:$0xff]  ;;  %v579_v50 = vld [vmem:[%s1974_s21 + $0xc0] sm:$0xff] }
 0x25e   : > { %741 = vmatprep.subr.mxu0 %v612_v32  ;;  %812 = vmatprep.subr.mxu1 %v614_v33  ;;  %v581_v51 = vld [vmem:[%s1974_s21 + $0xd0] sm:$0xff]  ;;  %v572_v52 = vld [vmem:[%s1974_s21 + $0x88] sm:$0xff]  ;;  %v574_v53 = vld [vmem:[%s1974_s21 + $0x98] sm:$0xff] }
 0x25f   : > { %742 = vmatpush1.msra.mxu0 %v611_v34  ;;  %813 = vmatpush1.msra.mxu1 %v613_v35  ;;  %v571_v54 = vld [vmem:[%s1974_s21 + $0x80] sm:$0xff]  ;;  %v573_v55 = vld [vmem:[%s1974_s21 + $0x90] sm:$0xff]  ;;  %v564_v56 = vld [vmem:[%s1974_s21 + $0x48] sm:$0xff] }
 0x260   : > { %743 = vmatprep.subr.mxu0 %v604_v36  ;;  %814 = vmatprep.subr.mxu1 %v606_v37  ;;  %v566_v57 = vld [vmem:[%s1974_s21 + $0x58] sm:$0xff]  ;;  %v563_v58 = vld [vmem:[%s1974_s21 + $0x40] sm:$0xff]  ;;  %v565_v59 = vld [vmem:[%s1974_s21 + $0x50] sm:$0xff] }
 0x261   : > { %744 = vmatpush1.msra.mxu0 %v603_v38  ;;  %815 = vmatpush1.msra.mxu1 %v605_v39  ;;  %v556_v60 = vld [vmem:[%s1974_s21 + $0x8] sm:$0xff]  ;;  %v558_v61 = vld [vmem:[%s1974_s21 + $0x18] sm:$0xff]  ;;  %v555_v62 = vld [vmem:[%s1974_s21] sm:$0xff] }
 0x262   : > { %745 = vmatprep.subr.mxu0 %v596_v40  ;;  %816 = vmatprep.subr.mxu1 %v598_v41  ;;  %v557_v63 = vld [vmem:[%s1974_s21 + $0x10] sm:$0xff]  ;;  %v2064_v0 = vld [vmem:[#allocation2] sm:$0xff]  ;;  %v682_v3 = vld [vmem:[%s1974_s21 + $0x3f8] sm:$0xff] }
 0x263   : > { %746 = vmatpush1.msra.mxu0 %v595_v42  ;;  %817 = vmatpush1.msra.mxu1 %v597_v43  ;;  %v680_v2 = vld [vmem:[%s1974_s21 + $0x3e8] sm:$0xff]  ;;  %v679_v4 = vld [vmem:[%s1974_s21 + $0x3e0] sm:$0xff]  ;;  %v681_v5 = vld [vmem:[%s1974_s21 + $0x3f0] sm:$0xff] }
 0x264   : > { %747 = vmatprep.subr.mxu0 %v588_v44  ;;  %818 = vmatprep.subr.mxu1 %v590_v45  ;;  %v672_v6 = vld [vmem:[%s1974_s21 + $0x3a8] sm:$0xff]  ;;  %v674_v7 = vld [vmem:[%s1974_s21 + $0x3b8] sm:$0xff]  ;;  %v671_v8 = vld [vmem:[%s1974_s21 + $0x3a0] sm:$0xff] }
 0x265   : > { %748 = vmatpush1.msra.mxu0 %v587_v46  ;;  %819 = vmatpush1.msra.mxu1 %v589_v47  ;;  %v673_v9 = vld [vmem:[%s1974_s21 + $0x3b0] sm:$0xff]  ;;  %v664_v10 = vld [vmem:[%s1974_s21 + $0x368] sm:$0xff]  ;;  %v666_v11 = vld [vmem:[%s1974_s21 + $0x378] sm:$0xff] }
 0x266   : > { %749 = vmatprep.subr.mxu0 %v580_v48  ;;  %820 = vmatprep.subr.mxu1 %v582_v49  ;;  %v663_v12 = vld [vmem:[%s1974_s21 + $0x360] sm:$0xff]  ;;  %v665_v13 = vld [vmem:[%s1974_s21 + $0x370] sm:$0xff]  ;;  %v656_v14 = vld [vmem:[%s1974_s21 + $0x328] sm:$0xff] }
 0x267   : > { %750 = vmatpush1.msra.mxu0 %v579_v50  ;;  %821 = vmatpush1.msra.mxu1 %v581_v51  ;;  %v658_v15 = vld [vmem:[%s1974_s21 + $0x338] sm:$0xff]  ;;  %v655_v16 = vld [vmem:[%s1974_s21 + $0x320] sm:$0xff]  ;;  %v657_v17 = vld [vmem:[%s1974_s21 + $0x330] sm:$0xff] }
 0x268   : > { %751 = vmatprep.subr.mxu0 %v572_v52  ;;  %822 = vmatprep.subr.mxu1 %v574_v53  ;;  %v648_v18 = vld [vmem:[%s1974_s21 + $0x2e8] sm:$0xff]  ;;  %v650_v19 = vld [vmem:[%s1974_s21 + $0x2f8] sm:$0xff]  ;;  %v647_v20 = vld [vmem:[%s1974_s21 + $0x2e0] sm:$0xff] }
 0x269   : > { %752 = vmatpush1.msra.mxu0 %v571_v54  ;;  %823 = vmatpush1.msra.mxu1 %v573_v55  ;;  %v649_v21 = vld [vmem:[%s1974_s21 + $0x2f0] sm:$0xff]  ;;  %v640_v22 = vld [vmem:[%s1974_s21 + $0x2a8] sm:$0xff]  ;;  %v642_v23 = vld [vmem:[%s1974_s21 + $0x2b8] sm:$0xff] }
 0x26a   : > { %753 = vmatprep.subr.mxu0 %v564_v56  ;;  %824 = vmatprep.subr.mxu1 %v566_v57  ;;  %v639_v24 = vld [vmem:[%s1974_s21 + $0x2a0] sm:$0xff]  ;;  %v641_v25 = vld [vmem:[%s1974_s21 + $0x2b0] sm:$0xff]  ;;  %v632_v26 = vld [vmem:[%s1974_s21 + $0x268] sm:$0xff] }
 0x26b   : > { %754 = vmatpush1.msra.mxu0 %v563_v58  ;;  %825 = vmatpush1.msra.mxu1 %v565_v59  ;;  %v634_v27 = vld [vmem:[%s1974_s21 + $0x278] sm:$0xff]  ;;  %v631_v28 = vld [vmem:[%s1974_s21 + $0x260] sm:$0xff]  ;;  %v633_v29 = vld [vmem:[%s1974_s21 + $0x270] sm:$0xff] }
 0x26c   : > { %755 = vmatprep.subr.mxu0 %v556_v60  ;;  %826 = vmatprep.subr.mxu1 %v558_v61  ;;  %v624_v30 = vld [vmem:[%s1974_s21 + $0x228] sm:$0xff]  ;;  %v626_v31 = vld [vmem:[%s1974_s21 + $0x238] sm:$0xff]  ;;  %v623_v32 = vld [vmem:[%s1974_s21 + $0x220] sm:$0xff] }
 0x26d   : > { %756 = vmatpush1.msra.mxu0 %v555_v62  ;;  %789 = vmatprep.mubr.f32.mxu0 %v1689_v1  ;;  %v625_v33 = vld [vmem:[%s1974_s21 + $0x230] sm:$0xff]  ;;  %v616_v34 = vld [vmem:[%s1974_s21 + $0x1e8] sm:$0xff]  ;;  %v618_v35 = vld [vmem:[%s1974_s21 + $0x1f8] sm:$0xff] }
 0x26e   : > { %827 = vmatpush1.msra.mxu1 %v557_v63  ;;  %860 = vmatprep.mubr.f32.mxu1 %v1689_v1  ;;  %v615_v36 = vld [vmem:[%s1974_s21 + $0x1e0] sm:$0xff]  ;;  %v617_v37 = vld [vmem:[%s1974_s21 + $0x1f0] sm:$0xff]  ;;  %v608_v38 = vld [vmem:[%s1974_s21 + $0x1a8] sm:$0xff] }
 0x26f   : > { %790 = vmatmul.mubr.f32.vlgmr.msra.gmra.mxu0 %v2064_v0  ;;  %861 = vmatmul.mubr.f32.vlgmr.msra.gmra.mxu1 %v2064_v0  ;;  %v610_v39 = vld [vmem:[%s1974_s21 + $0x1b8] sm:$0xff]  ;;  %v607_v40 = vld [vmem:[%s1974_s21 + $0x1a0] sm:$0xff]  ;;  %v609_v41 = vld [vmem:[%s1974_s21 + $0x1b0] sm:$0xff] }
 0x270   : > { %867 = vmatprep.subr.mxu0 %v680_v2  ;;  %938 = vmatprep.subr.mxu1 %v682_v3  ;;  %v600_v42 = vld [vmem:[%s1974_s21 + $0x168] sm:$0xff]  ;;  %v602_v43 = vld [vmem:[%s1974_s21 + $0x178] sm:$0xff]  ;;  %v599_v44 = vld [vmem:[%s1974_s21 + $0x160] sm:$0xff] }
 0x271   : > { %868 = vmatpush1.msra.mxu0 %v679_v4  ;;  %939 = vmatpush1.msra.mxu1 %v681_v5  ;;  %v601_v45 = vld [vmem:[%s1974_s21 + $0x170] sm:$0xff]  ;;  %v592_v46 = vld [vmem:[%s1974_s21 + $0x128] sm:$0xff]  ;;  %v594_v47 = vld [vmem:[%s1974_s21 + $0x138] sm:$0xff]  ;;  %v685_v4 = vlaneseq }
 0x272   : > { %869 = vmatprep.subr.mxu0 %v672_v6  ;;  %940 = vmatprep.subr.mxu1 %v674_v7  ;;  %v591_v48 = vld [vmem:[%s1974_s21 + $0x120] sm:$0xff]  ;;  %v593_v49 = vld [vmem:[%s1974_s21 + $0x130] sm:$0xff]  ;;  %v584_v50 = vld [vmem:[%s1974_s21 + $0xe8] sm:$0xff] }
 0x273   : > { %870 = vmatpush1.msra.mxu0 %v671_v8  ;;  %941 = vmatpush1.msra.mxu1 %v673_v9  ;;  %v586_v51 = vld [vmem:[%s1974_s21 + $0xf8] sm:$0xff]  ;;  %v583_v52 = vld [vmem:[%s1974_s21 + $0xe0] sm:$0xff]  ;;  %v585_v53 = vld [vmem:[%s1974_s21 + $0xf0] sm:$0xff]  ;;  %v686_v5 = vshrl.u32 %v685_v4, 7 }
 0x274   : > { %871 = vmatprep.subr.mxu0 %v664_v10  ;;  %942 = vmatprep.subr.mxu1 %v666_v11  ;;  %v576_v54 = vld [vmem:[%s1974_s21 + $0xa8] sm:$0xff]  ;;  %v578_v55 = vld [vmem:[%s1974_s21 + $0xb8] sm:$0xff]  ;;  %v575_v56 = vld [vmem:[%s1974_s21 + $0xa0] sm:$0xff] }
 0x275   : > { %872 = vmatpush1.msra.mxu0 %v663_v12  ;;  %943 = vmatpush1.msra.mxu1 %v665_v13  ;;  %v577_v57 = vld [vmem:[%s1974_s21 + $0xb0] sm:$0xff]  ;;  %v568_v58 = vld [vmem:[%s1974_s21 + $0x68] sm:$0xff]  ;;  %v570_v59 = vld [vmem:[%s1974_s21 + $0x78] sm:$0xff]  ;;  %v687_v6 = vsub.s32 0, %v686_v5  ;;  %v695_v7 = vsub.s32 2, %v686_v5  ;;  %v691_v9 = vsub.s32 1, %v686_v5 }
 0x276   : > { %873 = vmatprep.subr.mxu0 %v656_v14  ;;  %944 = vmatprep.subr.mxu1 %v658_v15  ;;  %v567_v60 = vld [vmem:[%s1974_s21 + $0x60] sm:$0xff]  ;;  %v569_v61 = vld [vmem:[%s1974_s21 + $0x70] sm:$0xff]  ;;  %v560_v62 = vld [vmem:[%s1974_s21 + $0x28] sm:$0xff]  ;;  %v699_v10 = vsub.s32 3, %v686_v5 }
 0x277   : > { %874 = vmatpush1.msra.mxu0 %v655_v16  ;;  %945 = vmatpush1.msra.mxu1 %v657_v17  ;;  %v562_v63 = vld [vmem:[%s1974_s21 + $0x38] sm:$0xff]  ;;  %v559_v2 = vld [vmem:[%s1974_s21 + $0x20] sm:$0xff]  ;;  %v561_v3 = vld [vmem:[%s1974_s21 + $0x30] sm:$0xff]  ;;  %s1193_s21 = sshll.u32 %s2281_s5, 4 }
 0x278   : > { %875 = vmatprep.subr.mxu0 %v648_v18  ;;  %946 = vmatprep.subr.mxu1 %v650_v19  ;;  %v683_v8 = vld [vmem:[%s354_s22] sm:$0xff]  ;;  %s1030_s23 = sadd.s32 %s1193_s21, %s1192_s11  ;;  %s1034_s22 = sshll.u32 %s1986_s1, 4  ;;  %s1035_s22 = int_to_ptr.vmem [resolvable:$true] %s1034_s22 }
 0x279   : > { %876 = vmatpush1.msra.mxu0 %v647_v20  ;;  %947 = vmatpush1.msra.mxu1 %v649_v21  ;;  %v688_v11 = vrot.slane %v683_v8, %v687_v6  ;;  %v696_v12 = vrot.slane %v683_v8, %v695_v7  ;;  %v692_v13 = vrot.slane %v683_v8, %v691_v9  ;;  %v703_v21 = vsub.s32 4, %v686_v5  ;;  %s1194_s16 = sshll.u32 %s1030_s23, 7  ;;  %s1523_s27 = scalar_lea.vmem %s1035_s22, 1024 }
 0x27a   : > { %877 = vmatprep.subr.mxu0 %v640_v22  ;;  %948 = vmatprep.subr.mxu1 %v642_v23  ;;  %v711_v22 = vsub.s32 6, %v686_v5  ;;  %v707_v23 = vsub.s32 5, %v686_v5  ;;  %s2152_s6 = scalar_lea.hbm %s2282_s0, %s1194_s16  ;;  %p1524_p4 = scmp.ne.s32.totalorder %s1035_s22, %s1523_s27 }
 0x27b   : > { %878 = vmatpush1.msra.mxu0 %v639_v24  ;;  %949 = vmatpush1.msra.mxu1 %v641_v25  ;;  %v715_v24 = vsub.s32 7, %v686_v5  ;;  %v704_v25 = vrot.slane %v683_v8, %v703_v21  ;;  %p1530_p10 = scmp.lt.s32.totalorder %s1035_s22, %s1528_s24  ;;  %p1531_p13 = scmp.lt.s32.totalorder %s1529_s15, %s1523_s27 }
 0x27c   : > { %879 = vmatprep.subr.mxu0 %v632_v26  ;;  %950 = vmatprep.subr.mxu1 %v634_v27  ;;  %v712_v26 = vrot.slane %v683_v8, %v711_v22  ;;  %v708_v27 = vrot.slane %v683_v8, %v707_v23  ;;  %p1525_p6 = pnand %p1524_p4, %p2283_p8 }
 0x27d   : > { %880 = vmatpush1.msra.mxu0 %v631_v28  ;;  %951 = vmatpush1.msra.mxu1 %v633_v29  ;;  %v716_v28 = vrot.slane %v683_v8, %v715_v24  ;;  %p1532_p11 = por %p1531_p13, %p1530_p10 }
 0x27e   : > { %881 = vmatprep.subr.mxu0 %v624_v30  ;;  %952 = vmatprep.subr.mxu1 %v626_v31  ;;  %p1526_p9 = pneg %p1525_p6 }
 0x27f   : > { %882 = vmatpush1.msra.mxu0 %v623_v32  ;;  %953 = vmatpush1.msra.mxu1 %v625_v33 }
 0x280   : > { %883 = vmatprep.subr.mxu0 %v616_v34  ;;  %954 = vmatprep.subr.mxu1 %v618_v35  ;;  %p1533_p7 = pnand %p1532_p11, %p1526_p9 }
 0x281   : > { %884 = vmatpush1.msra.mxu0 %v615_v36  ;;  %955 = vmatpush1.msra.mxu1 %v617_v37 }
 0x282   : > { %885 = vmatprep.subr.mxu0 %v608_v38  ;;  %956 = vmatprep.subr.mxu1 %v610_v39 }
 0x283   : > { %886 = vmatpush1.msra.mxu0 %v607_v40  ;;  %957 = vmatpush1.msra.mxu1 %v609_v41 }
 0x284   : > { %887 = vmatprep.subr.mxu0 %v600_v42  ;;  %958 = vmatprep.subr.mxu1 %v602_v43 }
 0x285   : > { %888 = vmatpush1.msra.mxu0 %v599_v44  ;;  %959 = vmatpush1.msra.mxu1 %v601_v45 }
 0x286   : > { %889 = vmatprep.subr.mxu0 %v592_v46  ;;  %960 = vmatprep.subr.mxu1 %v594_v47 }
 0x287   : > { %890 = vmatpush1.msra.mxu0 %v591_v48  ;;  %961 = vmatpush1.msra.mxu1 %v593_v49 }
 0x288   : > { %891 = vmatprep.subr.mxu0 %v584_v50  ;;  %962 = vmatprep.subr.mxu1 %v586_v51 }
 0x289   : > { %892 = vmatpush1.msra.mxu0 %v583_v52  ;;  %963 = vmatpush1.msra.mxu1 %v585_v53 }
 0x28a   : > { %893 = vmatprep.subr.mxu0 %v576_v54  ;;  %964 = vmatprep.subr.mxu1 %v578_v55 }
 0x28b   : > { %894 = vmatpush1.msra.mxu0 %v575_v56  ;;  %965 = vmatpush1.msra.mxu1 %v577_v57 }
 0x28c   : > { %895 = vmatprep.subr.mxu0 %v568_v58  ;;  %966 = vmatprep.subr.mxu1 %v570_v59 }
 0x28d   : > { %896 = vmatpush1.msra.mxu0 %v567_v60  ;;  %967 = vmatpush1.msra.mxu1 %v569_v61 }
 0x28e   : > { %897 = vmatprep.subr.mxu0 %v560_v62  ;;  %968 = vmatprep.subr.mxu1 %v562_v63 }
 0x28f   : > { %898 = vmatpush1.msra.mxu0 %v559_v2  ;;  %931 = vmatprep.mubr.f32.mxu0 %v1689_v1 }
 0x290   : > { %969 = vmatpush1.msra.mxu1 %v561_v3  ;;  %1002 = vmatprep.mubr.f32.mxu1 %v1689_v1  ;;  %v700_v1 = vrot.slane %v683_v8, %v699_v10 }
 0x291   : > { %932 = vmatmul.mubr.f32.vlgmr.msra.gmra.mxu0 %v2064_v0  ;;  %1003 = vmatmul.mubr.f32.vlgmr.msra.gmra.mxu1 %v2064_v0 }
 0x32f   : > { %v791_v14 = vpop.f32.mrf.mxu0  ;;  %v862_v0 = vpop.f32.mrf.mxu1 }
 0x330   : > { %v792_v15 = vadd.f32 %v791_v14, %v688_v11  ;;  %v863_v16 = vadd.f32 %v862_v0, %v696_v12 }
 0x331   : > { %v793_v17 = vpop.f32.mrf.mxu0  ;;  %v864_v18 = vpop.f32.mrf.mxu1 }
 0x332   : > { %1009 = vst [vmem:[%s1986_s1] sm:$0xff] %v792_v15  ;;  %1011 = vst [vmem:[%s1986_s1 + $0x10] sm:$0xff] %v863_v16  ;;  %v794_v19 = vadd.f32 %v793_v17, %v692_v13  ;;  %v865_v20 = vadd.f32 %v864_v18, %v700_v1 }
 0x334   : > { %1010 = vst [vmem:[%s1986_s1 + $0x8] sm:$0xff] %v794_v19  ;;  %1012 = vst [vmem:[%s1986_s1 + $0x18] sm:$0xff] %v865_v20 }
 0x351   : > { %v933_v29 = vpop.f32.mrf.mxu0  ;;  %v1004_v30 = vpop.f32.mrf.mxu1 }
 0x352   : > { %v934_v31 = vadd.f32 %v933_v29, %v704_v25  ;;  %v1005_v32 = vadd.f32 %v1004_v30, %v712_v26 }
 0x353   : > { %v935_v33 = vpop.f32.mrf.mxu0  ;;  %v1006_v34 = vpop.f32.mrf.mxu1 }
 0x354   : > { %1013 = vst [vmem:[%s1986_s1 + $0x20] sm:$0xff] %v934_v31  ;;  %1015 = vst [vmem:[%s1986_s1 + $0x30] sm:$0xff] %v1005_v32  ;;  %v936_v35 = vadd.f32 %v935_v33, %v708_v27  ;;  %v1007_v36 = vadd.f32 %v1006_v34, %v716_v28 }
 0x356   : > { %1014 = vst [vmem:[%s1986_s1 + $0x28] sm:$0xff] %v936_v35  ;;  %1016 = vst [vmem:[%s1986_s1 + $0x38] sm:$0xff] %v1007_v36 }
 0x357   : > { %1536 = shalt.err (!%p1533_p7)
}
 0x358   : > { %s1537_s1 = scalar_lea.hbm %s2152_s6, 1024  ;;  %s1541_s19 = scalar_lea.hbm %s2282_s0, 4096 }
 0x359   : > { %p1538_p5 = scmp.ne.s32.totalorder %s2152_s6, %s1537_s1  ;;  %p1542_p1 = scmp.lt.s32.totalorder %s2152_s6, %s2282_s0 }
 0x35a   : > { %p1543_p2 = scmp.lt.s32.totalorder %s1541_s19, %s1537_s1 }
 0x35b   : > { %p1539_p3 = pnand %p1538_p5, %p2283_p8 }
 0x35c   : > { %p1544_p12 = por %p1543_p2, %p1542_p1 }
 0x35d   : > { %p1540_p0 = pneg %p1539_p3 }
 0x35f   : > { %p1545_p4 = pnand %p1544_p12, %p1540_p0 }
 0x361   : > { %1548 = shalt.err (!%p1545_p4)
}
 0x362   : > { %1261 = dma.vmem_to_hbm [thread:$0]  (%p2283_p8), %s1035_s22, 1024, %s2152_s6, %s1018_s10  }
 0x363 PF: > { %s2284_s21 = sld [smem:[#allocation15_spill]]  ;;  %p1284_p6 = scmp.ge.s32.totalorder %s1675_s14, 2 }
 0x364   : > { %p2285_p9 = scmp.ne.s32.totalorder %s2267_s30, 0 }
 0x366   : > { %p1278_p10 = pnand %p1284_p6, %p2285_p9 }
 0x368   : > { %p1279_p13 = pneg %p1278_p10 }
 0x369   : > { %s1046_s23 = sand.u32 1, %s2284_s21  }
 0x36a   : > { %s1047_s16 = scalar_lea.sflag [#allocation5], %s1046_s23 }
 0x36b   : > { %1618 = dma.done.wait (%p1279_p13), %s1047_s16, 1024  }
 0x36c   : > { %1620 = vsyncadd (%p1279_p13), %s1047_s16, 4294966272  ;;  %s24_s14 = sadd.s32 1, %s1675_s14   ;;  %s2287_s3 = sld [smem:[#allocation21_spill]] }
 0x36d   : > { %p2179_p11 = scmp.ge.s32.totalorder %s24_s14, 6   ;;  %s2288_s11 = sld [smem:[#allocation18_spill]] }
 0x36e   : > { %s2289_s22 = sld [smem:[#allocation19_spill]]  ;;  %s2291_s24 = smov %s1627_s25 }
 0x36f   : > { %s2290_s13 = sld [smem:[#allocation20_spill]]  ;;  %s2292_s25 = smov %s1631_s26 }
 0x370   : > { %s2293_s26 = smov %s1844_s20  ;;  %s2294_s27 = smov %s1639_s28 }
 0x371   : > { %s2295_s28 = smov %s1643_s29  ;;  %s2297_s30 = smov %s1651_s8 }
 0x372   : > { %s2296_s29 = smov %s2287_s3  ;;  %s2298_s8 = smov %s1655_s9 }
 0x373   : > { %s2299_s9 = smov %s1839_s7  ;;  %s2300_s10 = smov %s1667_s12 }
 0x374   : > { %s2301_s12 = smov %s2289_s22  ;;  %23 = sbr.rel (!%p2179_p11) target bundleno = 20 (0x14), region = 123 }
 0x379   :  { %1052 = vsyncpa [#allocation4], 1 }
 0x37a   :  { %1054 = vsyncpa [#allocation4 + $0x1], 1 }
 0x37b   :  { %1055 = vsyncpa [#allocation7], 1 }
 0x37c   :  { %1056 = vsyncpa [#allocation5], 1 }
 0x37d   :  { %1058 = vsyncpa [#allocation5 + $0x1], 1 }

</bundles_post_ra>
